<compile_context>
chip_gen: v7x
topology: tpu7x:2x2x1
jax: 0.10.0
libtpu: 0.0.40
codegen_flags: <defaults>
</compile_context>

<pallas_src>
import functools
import numpy as np
import jax
import jax.numpy as jnp
from jax import lax
from jax.experimental import pallas as pl
from jax.experimental.pallas import tpu as pltpu

EPS_LN = 1e-8       # eps used by LN / reg1 / reg2 in the PyTorch module
EPS_GN_OUT = 1e-5   # default nn.GroupNorm eps used in the output head


# ----------------------------- kernel helpers ------------------------------ #

def _round_up(v, m):
    return ((v + m - 1) // m) * m


def _prelu(v, a):
    return jnp.where(v >= 0, v, a * v)


def _gn(v, gain, bias, inv_n, eps, tmask):
    """GroupNorm(1, .) over the valid (channels, T) region, fused affine.

    One-pass statistics (E[x^2] - m^2), scale/shift folded into a single FMA,
    output masked back to zero in padded time columns.
    """
    vm = v if tmask is None else jnp.where(tmask, v, 0.0)
    m = jnp.sum(vm) * inv_n
    var = jnp.maximum(jnp.sum(vm * vm) * inv_n - m * m, 0.0)
    scale = gain * lax.rsqrt(var + eps)            # (C, 1)
    shift = bias - m * scale                       # (C, 1)
    r = vm * scale + shift
    return r if tmask is None else jnp.where(tmask, r, 0.0)


# ------------------------------ fused kernel ------------------------------- #

def tcn_fused_kernel(cfg_ref,                                     # SMEM (NB,) int32
                     x_ref, w1_ref, wd_ref, wr_ref, vc_ref, vh_ref,
                     misc_ref, hw_ref, hb_ref,
                     o_ref,
                     out_acc, ypad, ystack,
                     *, T, Tp, halo, ksize, dil_cfgs,
                     c_dim, h_dim, eps_ln, eps_out):
    blk = pl.program_id(1)
    nblk = pl.num_programs(1)
    inv_ct = 1.0 / (c_dim * T)
    inv_ht = 1.0 / (h_dim * T)

    tmask = None
    if Tp != T:
        tmask = lax.broadcasted_iota(jnp.int32, (1, Tp), 1) < T

    # ---- first block step of this batch element: initial GroupNorm(1,C)(x) ----
    @pl.when(blk == 0)
    def _():
        ln_g = misc_ref[:, 0:1]
        ln_b = misc_ref[:, 1:2]
        out_acc[...] = _gn(x_ref[0], ln_g, ln_b, inv_ct, eps_ln, tmask)
        # zero the conv halo once per batch element; the middle is rewritten
        # every block step and the valid activation is masked to zero past T.
        # halo is a multiple of 128 -> both stores are lane-aligned, unmasked.
        zeros_halo = jnp.zeros((c_dim, halo), jnp.float32)
        ypad[:, 0:halo] = zeros_halo
        ypad[:, halo + Tp:halo + Tp + halo] = zeros_halo

    x0 = out_acc[...]                                              # (C, Tp)

    # packed per-block vectors: columns [b1, g1, be1, br, a1] and [bd, g2, be2, a2]
    b1 = vc_ref[0, :, 0:1]
    g1 = vc_ref[0, :, 1:2]
    be1 = vc_ref[0, :, 2:3]
    br = vc_ref[0, :, 3:4]
    a1 = vc_ref[0, :, 4:5]
    bd = vh_ref[0, :, 0:1]
    g2 = vh_ref[0, :, 1:2]
    be2 = vh_ref[0, :, 2:3]
    a2 = vh_ref[0, :, 3:4]

    # 1x1 conv -> PReLU -> (Dropout2d = identity in eval) -> GroupNorm(1, C)
    y = jnp.dot(w1_ref[0], x0, preferred_element_type=jnp.float32) + b1
    y = _gn(_prelu(y, a1), g1, be1, inv_ct, eps_ln, tmask)

    # stage conv input into the zero-halo scratch (lane-aligned offset)
    ypad[:, halo:halo + Tp] = y

    # build the stacked shifted activation (K*C, Tp) with static slices;
    # dispatch over the (small) set of distinct static (dilation, padding).
    def build_stack(d, p):
        for k in range(ksize):
            s = halo + k * d - p
            ystack[k * c_dim:(k + 1) * c_dim, :] = ypad[:, s:s + Tp]

    if len(dil_cfgs) == 1:
        build_stack(*dil_cfgs[0])
    else:
        cfg = cfg_ref[blk]
        for j, (d, p) in enumerate(dil_cfgs):
            @pl.when(cfg == j)
            def _(d=d, p=p):
                build_stack(d, p)

    # grouped dilated conv as ONE matmul -> PReLU -> GroupNorm(1, H)
    z = jnp.dot(wd_ref[0], ystack[...], preferred_element_type=jnp.float32) + bd
    z = _gn(_prelu(z, a2), g2, be2, inv_ht, eps_ln, tmask)

    # residual 1x1 conv, accumulate into the resident activation
    res = jnp.dot(wr_ref[0], z, preferred_element_type=jnp.float32) + br
    if tmask is not None:
        res = jnp.where(tmask, res, 0.0)
    new_out = x0 + res
    out_acc[...] = new_out

    # ---- last block step: output head PReLU -> GroupNorm(1,C) -> 1x1 conv ----
    @pl.when(blk == nblk - 1)
    def _():
        og = misc_ref[:, 2:3]
        ob = misc_ref[:, 3:4]
        ah = misc_ref[:, 4:5]
        v = _gn(_prelu(new_out, ah), og, ob, inv_ct, eps_out, tmask)
        o_ref[0] = jnp.dot(hw_ref[...], v, preferred_element_type=jnp.float32) + hb_ref[...]


# -------------------------------- wrapper ---------------------------------- #

def tcn_pallas(x, params):
    B, C, T = x.shape
    blocks = params["blocks"]
    NB = len(blocks)
    K, H, _ = blocks[0]["wd_dense"].shape
    out_dim = params["out_w"].shape[0]

    Tp = max(_round_up(T, 128), 128)               # lane-dense time axis

    dil_list = [int(b["dilation"]) for b in blocks]
    pad_list = [int(b["padding"]) for b in blocks]
    for d, p in zip(dil_list, pad_list):
        # non-causal 'same' conv (residual add requires equal lengths)
        assert 2 * p == d * (K - 1), "only the non-causal 'same' conv path is supported"
    dil_cfgs = sorted(set(zip(dil_list, pad_list)))
    cfg = jnp.asarray([dil_cfgs.index((d, p)) for d, p in zip(dil_list, pad_list)],
                      jnp.int32)
    maxpad = max(max(p, d * (K - 1) - p) for d, p in zip(dil_list, pad_list))
    halo = max(_round_up(maxpad, 128), 128)        # lane-aligned halo width

    # stacked per-block weights (leading block axis => pipelined weight prefetch)
    W1 = jnp.stack([b["w1"] for b in blocks])                                 # (NB, C, C)
    Wd = jnp.stack([jnp.transpose(b["wd_dense"], (1, 0, 2)).reshape(H, K * C)
                    for b in blocks])                                         # (NB, H, K*C)
    Wr = jnp.stack([b["wr"] for b in blocks])                                 # (NB, C, H)
    vC = jnp.stack([jnp.stack([b["b1"], b["g1"], b["be1"], b["br"],
                               jnp.full((C,), b["a1"], jnp.float32)], axis=1)
                    for b in blocks])                                         # (NB, C, 5)
    vH = jnp.stack([jnp.stack([b["bd"], b["g2"], b["be2"],
                               jnp.full((H,), b["a2"], jnp.float32)], axis=1)
                    for b in blocks])                                         # (NB, H, 4)
    misc = jnp.stack([params["ln_g"], params["ln_b"],
                      params["out_g"], params["out_be"],
                      jnp.full((C,), params["out_a"], jnp.float32)], axis=1)  # (C, 5)
    head_w = params["out_w"]                                                  # (out_dim, C)
    head_b = params["out_b"].reshape(out_dim, 1)

    xp = x if Tp == T else jnp.pad(x, ((0, 0), (0, 0), (0, Tp - T)))

    kern = functools.partial(
        tcn_fused_kernel, T=T, Tp=Tp, halo=halo, ksize=K,
        dil_cfgs=tuple(dil_cfgs), c_dim=C, h_dim=H,
        eps_ln=EPS_LN, eps_out=EPS_GN_OUT)

    grid_spec = pltpu.PrefetchScalarGridSpec(
        num_scalar_prefetch=1,
        grid=(B, NB),
        in_specs=[
            pl.BlockSpec((1, C, Tp), lambda b, k, s: (b, 0, 0)),       # x (per batch)
            pl.BlockSpec((1, C, C), lambda b, k, s: (k, 0, 0)),        # W1 per block
            pl.BlockSpec((1, H, K * C), lambda b, k, s: (k, 0, 0)),    # Wd per block
            pl.BlockSpec((1, C, H), lambda b, k, s: (k, 0, 0)),        # Wr per block
            pl.BlockSpec((1, C, 5), lambda b, k, s: (k, 0, 0)),        # packed C-vectors
            pl.BlockSpec((1, H, 4), lambda b, k, s: (k, 0, 0)),        # packed H-vectors
            pl.BlockSpec((C, 5), lambda b, k, s: (0, 0)),              # LN/head affines
            pl.BlockSpec((out_dim, C), lambda b, k, s: (0, 0)),        # head weight
            pl.BlockSpec((out_dim, 1), lambda b, k, s: (0, 0)),        # head bias
        ],
        out_specs=pl.BlockSpec((1, out_dim, Tp), lambda b, k, s: (b, 0, 0)),
        scratch_shapes=[
            pltpu.VMEM((C, Tp), jnp.float32),               # resident activation
            pltpu.VMEM((C, Tp + 2 * halo), jnp.float32),    # conv input + zero halo
            pltpu.VMEM((K * C, Tp), jnp.float32),           # stacked shifted taps
        ],
    )

    out = pl.pallas_call(
        kern,
        out_shape=jax.ShapeDtypeStruct((B, out_dim, Tp), jnp.float32),
        grid_spec=grid_spec,
        compiler_params=pltpu.CompilerParams(
            dimension_semantics=("parallel", "arbitrary")),
    )(cfg, xp, W1, Wd, Wr, vC, vH, misc, head_w, head_b)

    return out[:, :, :T] if Tp != T else out


# --------------------- parameter setup (glue, plain JAX) ------------------- #

def expand_grouped_weight(w_g, C):
    """PyTorch grouped Conv1d weight (H, C//G, K) -> dense (K, H, C)."""
    w_g = np.asarray(w_g)
    H, in_pg, K = w_g.shape
    G = C // in_pg
    out_pg = H // G
    dense = np.zeros((K, H, C), np.float32)
    for h in range(H):
        g = h // out_pg
        dense[:, h, g * in_pg:(g + 1) * in_pg] = w_g[h].T
    return jnp.asarray(dense)


def make_params(key, C, H, out_dim, layer, R, kernel=3):
    ks = iter(jax.random.split(key, 8 + 16 * layer * R))

    def nrm(shape, scale):
        return scale * jax.random.normal(next(ks), shape, jnp.float32)

    params = {
        "ln_g": 1.0 + nrm((C,), 0.1),
        "ln_b": nrm((C,), 0.1),
        "blocks": [],
        "out_a": 0.25,
        "out_g": 1.0 + nrm((C,), 0.1),
        "out_be": nrm((C,), 0.1),
        "out_w": nrm((out_dim, C), 0.2),
        "out_b": nrm((out_dim,), 0.1),
    }
    groups = H // 4
    for r in range(R):
        for i in range(layer):
            # schedule as in the PyTorch module (dilated branch): 1, 2*i
            dil = 1 if i == 0 else 2 * i
            pad = dil
            wd_g = nrm((H, C // groups, kernel), 0.2)
            blk = {
                "dilation": dil, "padding": pad, "groups": groups,
                "w1": nrm((C, C), 0.2), "b1": nrm((C,), 0.1),
                "a1": 0.25,
                "g1": 1.0 + nrm((C,), 0.1), "be1": nrm((C,), 0.1),
                "wd_g": wd_g, "wd_dense": expand_grouped_weight(wd_g, C),
                "bd": nrm((H,), 0.1),
                "a2": 0.25,
                "g2": 1.0 + nrm((H,), 0.1), "be2": nrm((H,), 0.1),
                "wr": nrm((C, H), 0.2), "br": nrm((C,), 0.1),
            }
            params["blocks"].append(blk)
    return params


# ----------------------- pure-JAX reference (for check) -------------------- #

def ref_gn(x, g, b, eps):
    m = x.mean(axis=(1, 2), keepdims=True)
    v = ((x - m) ** 2).mean(axis=(1, 2), keepdims=True)
    return (x - m) / jnp.sqrt(v + eps) * g[None, :, None] + b[None, :, None]


def ref_pointwise(x, w, b):
    return jnp.einsum("oc,bct->bot", w, x) + b[None, :, None]


def ref_grouped_conv(x, w, b, dilation, padding, groups):
    y = lax.conv_general_dilated(
        x, w, window_strides=(1,), padding=[(padding, padding)],
        rhs_dilation=(dilation,), dimension_numbers=("NCH", "OIH", "NCH"),
        feature_group_count=groups)
    return y + b[None, :, None]


def tcn_ref(x, params):
    out = ref_gn(x, params["ln_g"], params["ln_b"], EPS_LN)
    for blk in params["blocks"]:
        y = _prelu(ref_pointwise(out, blk["w1"], blk["b1"]), blk["a1"])
        y = ref_gn(y, blk["g1"], blk["be1"], EPS_LN)
        y = ref_grouped_conv(y, blk["wd_g"], blk["bd"],
                             blk["dilation"], blk["padding"], blk["groups"])
        y = _prelu(y, blk["a2"])
        y = ref_gn(y, blk["g2"], blk["be2"], EPS_LN)
        out = out + ref_pointwise(y, blk["wr"], blk["br"])
    y = _prelu(out, params["out_a"])
    y = ref_gn(y, params["out_g"], params["out_be"], EPS_GN_OUT)
    return ref_pointwise(y, params["out_w"], params["out_b"])


# ---------------------------------- main ----------------------------------- #

if __name__ == "__main__":
    # Small shapes: input_dim == BN_dim (required since learnable_encoder_decoder
    # is False), H_dim divisible by 4, and BN_dim divisible by (H_dim // 4).
    B, C, H, T = 2, 16, 16, 64
    out_dim, layer, R, kernel = 8, 2, 2, 3

    key = jax.random.PRNGKey(0)
    kx, kp = jax.random.split(key)
    x = jax.random.normal(kx, (B, C, T), jnp.float32)
    params = make_params(kp, C, H, out_dim, layer, R, kernel)

    out = tcn_pallas(x, params)
    out = jax.block_until_ready(out)

    ref = jax.block_until_ready(tcn_ref(x, params))
    assert out.shape == (B, out_dim, T), out.shape
    np.testing.assert_allclose(np.asarray(out), np.asarray(ref),
                               rtol=2e-3, atol=2e-3)

    # TODO(synk): Dropout2d is treated as identity (eval mode); the causal cLN,
    # weight_norm, skip, tf_attention and recursive/residual-LN branches are not
    # exercised by the default TCN forward path and are not implemented.
    print("KERNEL_OK")
</pallas_src>

<mosaic_0001>
module attributes {stable_mosaic.version = 11 : i64} {
  func.func @tcn_fused_kernel(%arg0: i32, %arg1: i32, %arg2: memref<4xi32, #tpu.memory_space<smem>>, %arg3: memref<1x16x128xf32, #tpu.memory_space<vmem>>, %arg4: memref<1x16x16xf32, #tpu.memory_space<vmem>>, %arg5: memref<1x16x48xf32, #tpu.memory_space<vmem>>, %arg6: memref<1x16x16xf32, #tpu.memory_space<vmem>>, %arg7: memref<1x16x5xf32, #tpu.memory_space<vmem>>, %arg8: memref<1x16x4xf32, #tpu.memory_space<vmem>>, %arg9: memref<16x5xf32, #tpu.memory_space<vmem>>, %arg10: memref<8x16xf32, #tpu.memory_space<vmem>>, %arg11: memref<8x1xf32, #tpu.memory_space<vmem>>, %arg12: memref<1x8x128xf32, #tpu.memory_space<vmem>>, %arg13: memref<16x128xf32, #tpu.memory_space<vmem>>, %arg14: memref<16x384xf32, #tpu.memory_space<vmem>>, %arg15: memref<48x128xf32, #tpu.memory_space<vmem>>) attributes {dimension_semantics = [#tpu.dimension_semantics<parallel>, #tpu.dimension_semantics<arbitrary>], iteration_bounds = array<i64: 2, 4>, scalar_prefetch = 1 : i64, scratch_operands = 3 : i64, tpu.core_type = #tpu.core_type<tc>, window_params = [{transform_indices = @transform_0, window_bounds = array<i64: 1, 16, 128>}, {transform_indices = @transform_1, window_bounds = array<i64: 1, 16, 16>}, {transform_indices = @transform_2, window_bounds = array<i64: 1, 16, 48>}, {transform_indices = @transform_3, window_bounds = array<i64: 1, 16, 16>}, {transform_indices = @transform_4, window_bounds = array<i64: 1, 16, 5>}, {transform_indices = @transform_5, window_bounds = array<i64: 1, 16, 4>}, {pipeline_mode = #tpu.pipeline_mode<synchronous>, transform_indices = @transform_6, window_bounds = array<i64: 16, 5>}, {pipeline_mode = #tpu.pipeline_mode<synchronous>, transform_indices = @transform_7, window_bounds = array<i64: 8, 16>}, {pipeline_mode = #tpu.pipeline_mode<synchronous>, transform_indices = @transform_8, window_bounds = array<i64: 8, 1>}, {transform_indices = @transform_9, window_bounds = array<i64: 1, 8, 128>}]} {
    %0 = tpu.iota {dimensions = array<i32: 1>} : vector<1x128xi32>
    %c64_i32 = arith.constant 64 : i32
    %1 = vector.broadcast %c64_i32 : i32 to vector<1x128xi32>
    %2 = arith.cmpi slt, %0, %1 : vector<1x128xi32>
    %c0_i32 = arith.constant 0 : i32
    %3 = arith.cmpi eq, %arg1, %c0_i32 : i32
    %4 = arith.extui %3 : i1 to i32
    %c0_i32_0 = arith.constant 0 : i32
    %5 = arith.cmpi ne, %4, %c0_i32_0 : i32
    scf.if %5 {
      %c0_64 = arith.constant 0 : index
      %c0_65 = arith.constant 0 : index
      %135 = vector.load %arg9[%c0_64, %c0_65] : memref<16x5xf32, #tpu.memory_space<vmem>>, vector<16x1xf32>
      %c0_66 = arith.constant 0 : index
      %c1_67 = arith.constant 1 : index
      %136 = vector.load %arg9[%c0_66, %c1_67] : memref<16x5xf32, #tpu.memory_space<vmem>>, vector<16x1xf32>
      %c0_68 = arith.constant 0 : index
      %c0_69 = arith.constant 0 : index
      %c0_70 = arith.constant 0 : index
      %137 = vector.load %arg3[%c0_68, %c0_69, %c0_70] : memref<1x16x128xf32, #tpu.memory_space<vmem>>, vector<1x16x128xf32>
      %138 = vector.shape_cast %137 : vector<1x16x128xf32> to vector<16x128xf32>
      %cst_71 = arith.constant 0.000000e+00 : f32
      %139 = vector.shape_cast %2 : vector<1x128xi1> to vector<1x128xi1>
      %140 = vector.broadcast %139 : vector<1x128xi1> to vector<16x128xi1>
      %141 = vector.broadcast %cst_71 : f32 to vector<16x128xf32>
      %142 = arith.select %140, %138, %141 : vector<16x128xi1>, vector<16x128xf32>
      %143 = vector.shape_cast %142 : vector<16x128xf32> to vector<1x16x128xf32>
      %cst_72 = arith.constant dense<0.000000e+00> : vector<1xf32>
      %144 = vector.multi_reduction <add>, %143, %cst_72 [1, 2] : vector<1x16x128xf32> to vector<1xf32>
      %145 = vector.shape_cast %144 : vector<1xf32> to vector<1x1x1xf32>
      %146 = vector.extract %145[0, 0, 0] : f32 from vector<1x1x1xf32>
      %cst_73 = arith.constant 9.765625E-4 : f32
      %147 = arith.mulf %146, %cst_73 : f32
      %148 = arith.mulf %142, %142 : vector<16x128xf32>
      %149 = vector.shape_cast %148 : vector<16x128xf32> to vector<1x16x128xf32>
      %cst_74 = arith.constant dense<0.000000e+00> : vector<1xf32>
      %150 = vector.multi_reduction <add>, %149, %cst_74 [1, 2] : vector<1x16x128xf32> to vector<1xf32>
      %151 = vector.shape_cast %150 : vector<1xf32> to vector<1x1x1xf32>
      %152 = vector.extract %151[0, 0, 0] : f32 from vector<1x1x1xf32>
      %cst_75 = arith.constant 9.765625E-4 : f32
      %153 = arith.mulf %152, %cst_75 : f32
      %154 = arith.mulf %147, %147 : f32
      %155 = arith.subf %153, %154 : f32
      %cst_76 = arith.constant 0.000000e+00 : f32
      %156 = arith.maximumf %155, %cst_76 : f32
      %cst_77 = arith.constant 9.99999993E-9 : f32
      %157 = arith.addf %156, %cst_77 : f32
      %158 = math.rsqrt %157 : f32
      %159 = vector.broadcast %158 : f32 to vector<16x1xf32>
      %160 = arith.mulf %135, %159 : vector<16x1xf32>
      %161 = vector.broadcast %147 : f32 to vector<16x1xf32>
      %162 = arith.mulf %161, %160 : vector<16x1xf32>
      %163 = arith.subf %136, %162 : vector<16x1xf32>
      %164 = vector.broadcast %160 : vector<16x1xf32> to vector<16x128xf32>
      %165 = arith.mulf %142, %164 : vector<16x128xf32>
      %166 = vector.broadcast %163 : vector<16x1xf32> to vector<16x128xf32>
      %167 = arith.addf %165, %166 : vector<16x128xf32>
      %cst_78 = arith.constant 0.000000e+00 : f32
      %168 = vector.shape_cast %2 : vector<1x128xi1> to vector<1x128xi1>
      %169 = vector.broadcast %168 : vector<1x128xi1> to vector<16x128xi1>
      %170 = vector.broadcast %cst_78 : f32 to vector<16x128xf32>
      %171 = arith.select %169, %167, %170 : vector<16x128xi1>, vector<16x128xf32>
      %c0_79 = arith.constant 0 : index
      %c0_80 = arith.constant 0 : index
      %172 = vector.load %arg13[%c0_79, %c0_80] : memref<16x128xf32, #tpu.memory_space<vmem>>, vector<16x128xf32>
      tpu.vector_store %arg13[%c0_79, %c0_80], %171 {strides = array<i32>} : memref<16x128xf32, #tpu.memory_space<vmem>>, vector<16x128xf32>,
      %cst_81 = arith.constant 0.000000e+00 : f32
      %173 = vector.broadcast %cst_81 : f32 to vector<16x128xf32>
      %c0_82 = arith.constant 0 : index
      %c0_83 = arith.constant 0 : index
      %174 = vector.load %arg14[%c0_82, %c0_83] : memref<16x384xf32, #tpu.memory_space<vmem>>, vector<16x128xf32>
      tpu.vector_store %arg14[%c0_82, %c0_83], %173 {strides = array<i32>} : memref<16x384xf32, #tpu.memory_space<vmem>>, vector<16x128xf32>,
      %c0_84 = arith.constant 0 : index
      %c256 = arith.constant 256 : index
      %175 = vector.load %arg14[%c0_84, %c256] : memref<16x384xf32, #tpu.memory_space<vmem>>, vector<16x128xf32>
      tpu.vector_store %arg14[%c0_84, %c256], %173 {strides = array<i32>} : memref<16x384xf32, #tpu.memory_space<vmem>>, vector<16x128xf32>,
    } else {
    }
    %c0 = arith.constant 0 : index
    %c0_1 = arith.constant 0 : index
    %6 = vector.load %arg13[%c0, %c0_1] : memref<16x128xf32, #tpu.memory_space<vmem>>, vector<16x128xf32>
    %c0_2 = arith.constant 0 : index
    %c0_3 = arith.constant 0 : index
    %c0_4 = arith.constant 0 : index
    %7 = vector.load %arg7[%c0_2, %c0_3, %c0_4] : memref<1x16x5xf32, #tpu.memory_space<vmem>>, vector<1x16x1xf32>
    %8 = vector.shape_cast %7 : vector<1x16x1xf32> to vector<16x1xf32>
    %c0_5 = arith.constant 0 : index
    %c0_6 = arith.constant 0 : index
    %c1 = arith.constant 1 : index
    %9 = vector.load %arg7[%c0_5, %c0_6, %c1] : memref<1x16x5xf32, #tpu.memory_space<vmem>>, vector<1x16x1xf32>
    %10 = vector.shape_cast %9 : vector<1x16x1xf32> to vector<16x1xf32>
    %c0_7 = arith.constant 0 : index
    %c0_8 = arith.constant 0 : index
    %c2 = arith.constant 2 : index
    %11 = vector.load %arg7[%c0_7, %c0_8, %c2] : memref<1x16x5xf32, #tpu.memory_space<vmem>>, vector<1x16x1xf32>
    %12 = vector.shape_cast %11 : vector<1x16x1xf32> to vector<16x1xf32>
    %c0_9 = arith.constant 0 : index
    %c0_10 = arith.constant 0 : index
    %c3 = arith.constant 3 : index
    %13 = vector.load %arg7[%c0_9, %c0_10, %c3] : memref<1x16x5xf32, #tpu.memory_space<vmem>>, vector<1x16x1xf32>
    %14 = vector.shape_cast %13 : vector<1x16x1xf32> to vector<16x1xf32>
    %c0_11 = arith.constant 0 : index
    %c0_12 = arith.constant 0 : index
    %c4 = arith.constant 4 : index
    %15 = vector.load %arg7[%c0_11, %c0_12, %c4] : memref<1x16x5xf32, #tpu.memory_space<vmem>>, vector<1x16x1xf32>
    %16 = vector.shape_cast %15 : vector<1x16x1xf32> to vector<16x1xf32>
    %c0_13 = arith.constant 0 : index
    %c0_14 = arith.constant 0 : index
    %c0_15 = arith.constant 0 : index
    %17 = vector.load %arg8[%c0_13, %c0_14, %c0_15] : memref<1x16x4xf32, #tpu.memory_space<vmem>>, vector<1x16x1xf32>
    %18 = vector.shape_cast %17 : vector<1x16x1xf32> to vector<16x1xf32>
    %c0_16 = arith.constant 0 : index
    %c0_17 = arith.constant 0 : index
    %c1_18 = arith.constant 1 : index
    %19 = vector.load %arg8[%c0_16, %c0_17, %c1_18] : memref<1x16x4xf32, #tpu.memory_space<vmem>>, vector<1x16x1xf32>
    %20 = vector.shape_cast %19 : vector<1x16x1xf32> to vector<16x1xf32>
    %c0_19 = arith.constant 0 : index
    %c0_20 = arith.constant 0 : index
    %c2_21 = arith.constant 2 : index
    %21 = vector.load %arg8[%c0_19, %c0_20, %c2_21] : memref<1x16x4xf32, #tpu.memory_space<vmem>>, vector<1x16x1xf32>
    %22 = vector.shape_cast %21 : vector<1x16x1xf32> to vector<16x1xf32>
    %c0_22 = arith.constant 0 : index
    %c0_23 = arith.constant 0 : index
    %c3_24 = arith.constant 3 : index
    %23 = vector.load %arg8[%c0_22, %c0_23, %c3_24] : memref<1x16x4xf32, #tpu.memory_space<vmem>>, vector<1x16x1xf32>
    %24 = vector.shape_cast %23 : vector<1x16x1xf32> to vector<16x1xf32>
    %c0_25 = arith.constant 0 : index
    %c0_26 = arith.constant 0 : index
    %c0_27 = arith.constant 0 : index
    %25 = vector.load %arg4[%c0_25, %c0_26, %c0_27] : memref<1x16x16xf32, #tpu.memory_space<vmem>>, vector<1x16x16xf32>
    %26 = vector.shape_cast %25 : vector<1x16x16xf32> to vector<16x16xf32>
    %cst = arith.constant dense<0.000000e+00> : vector<16x128xf32>
    %27 = tpu.matmul %26, %6, %cst {dimension_numbers = #tpu.dot_dimension_numbers<[1], [0], [0], [1], [0, 0, 1, 1], [], []>} : vector<16x16xf32>, vector<16x128xf32>, vector<16x128xf32> -> vector<16x128xf32>
    %28 = vector.broadcast %8 : vector<16x1xf32> to vector<16x128xf32>
    %29 = arith.addf %27, %28 : vector<16x128xf32>
    %cst_28 = arith.constant 0.000000e+00 : f32
    %30 = vector.broadcast %cst_28 : f32 to vector<16x128xf32>
    %31 = arith.cmpf oge, %29, %30 : vector<16x128xf32>
    %32 = vector.broadcast %16 : vector<16x1xf32> to vector<16x128xf32>
    %33 = arith.mulf %32, %29 : vector<16x128xf32>
    %34 = arith.select %31, %29, %33 : vector<16x128xi1>, vector<16x128xf32>
    %cst_29 = arith.constant 0.000000e+00 : f32
    %35 = vector.shape_cast %2 : vector<1x128xi1> to vector<1x128xi1>
    %36 = vector.broadcast %35 : vector<1x128xi1> to vector<16x128xi1>
    %37 = vector.broadcast %cst_29 : f32 to vector<16x128xf32>
    %38 = arith.select %36, %34, %37 : vector<16x128xi1>, vector<16x128xf32>
    %39 = vector.shape_cast %38 : vector<16x128xf32> to vector<1x16x128xf32>
    %cst_30 = arith.constant dense<0.000000e+00> : vector<1xf32>
    %40 = vector.multi_reduction <add>, %39, %cst_30 [1, 2] : vector<1x16x128xf32> to vector<1xf32>
    %41 = vector.shape_cast %40 : vector<1xf32> to vector<1x1x1xf32>
    %42 = vector.extract %41[0, 0, 0] : f32 from vector<1x1x1xf32>
    %cst_31 = arith.constant 9.765625E-4 : f32
    %43 = arith.mulf %42, %cst_31 : f32
    %44 = arith.mulf %38, %38 : vector<16x128xf32>
    %45 = vector.shape_cast %44 : vector<16x128xf32> to vector<1x16x128xf32>
    %cst_32 = arith.constant dense<0.000000e+00> : vector<1xf32>
    %46 = vector.multi_reduction <add>, %45, %cst_32 [1, 2] : vector<1x16x128xf32> to vector<1xf32>
    %47 = vector.shape_cast %46 : vector<1xf32> to vector<1x1x1xf32>
    %48 = vector.extract %47[0, 0, 0] : f32 from vector<1x1x1xf32>
    %cst_33 = arith.constant 9.765625E-4 : f32
    %49 = arith.mulf %48, %cst_33 : f32
    %50 = arith.mulf %43, %43 : f32
    %51 = arith.subf %49, %50 : f32
    %cst_34 = arith.constant 0.000000e+00 : f32
    %52 = arith.maximumf %51, %cst_34 : f32
    %cst_35 = arith.constant 9.99999993E-9 : f32
    %53 = arith.addf %52, %cst_35 : f32
    %54 = math.rsqrt %53 : f32
    %55 = vector.broadcast %54 : f32 to vector<16x1xf32>
    %56 = arith.mulf %10, %55 : vector<16x1xf32>
    %57 = vector.broadcast %43 : f32 to vector<16x1xf32>
    %58 = arith.mulf %57, %56 : vector<16x1xf32>
    %59 = arith.subf %12, %58 : vector<16x1xf32>
    %60 = vector.broadcast %56 : vector<16x1xf32> to vector<16x128xf32>
    %61 = arith.mulf %38, %60 : vector<16x128xf32>
    %62 = vector.broadcast %59 : vector<16x1xf32> to vector<16x128xf32>
    %63 = arith.addf %61, %62 : vector<16x128xf32>
    %cst_36 = arith.constant 0.000000e+00 : f32
    %64 = vector.shape_cast %2 : vector<1x128xi1> to vector<1x128xi1>
    %65 = vector.broadcast %64 : vector<1x128xi1> to vector<16x128xi1>
    %66 = vector.broadcast %cst_36 : f32 to vector<16x128xf32>
    %67 = arith.select %65, %63, %66 : vector<16x128xi1>, vector<16x128xf32>
    %c0_37 = arith.constant 0 : index
    %c128 = arith.constant 128 : index
    %68 = vector.load %arg14[%c0_37, %c128] : memref<16x384xf32, #tpu.memory_space<vmem>>, vector<16x128xf32>
    tpu.vector_store %arg14[%c0_37, %c128], %67 {strides = array<i32>} : memref<16x384xf32, #tpu.memory_space<vmem>>, vector<16x128xf32>,
    %69 = arith.index_cast %arg1 : i32 to index
    %70 = memref.load %arg2[%69] : memref<4xi32, #tpu.memory_space<smem>>
    %c0_i32_38 = arith.constant 0 : i32
    %71 = arith.cmpi eq, %70, %c0_i32_38 : i32
    %72 = arith.extui %71 : i1 to i32
    %c0_i32_39 = arith.constant 0 : i32
    %73 = arith.cmpi ne, %72, %c0_i32_39 : i32
    scf.if %73 {
      %c0_64 = arith.constant 0 : index
      %c127 = arith.constant 127 : index
      %135 = vector.load %arg14[%c0_64, %c127] : memref<16x384xf32, #tpu.memory_space<vmem>>, vector<16x128xf32>
      %c0_65 = arith.constant 0 : index
      %c0_66 = arith.constant 0 : index
      %136 = vector.load %arg15[%c0_65, %c0_66] : memref<48x128xf32, #tpu.memory_space<vmem>>, vector<16x128xf32>
      tpu.vector_store %arg15[%c0_65, %c0_66], %135 {strides = array<i32>} : memref<48x128xf32, #tpu.memory_space<vmem>>, vector<16x128xf32>,
      %c0_67 = arith.constant 0 : index
      %c128_68 = arith.constant 128 : index
      %137 = vector.load %arg14[%c0_67, %c128_68] : memref<16x384xf32, #tpu.memory_space<vmem>>, vector<16x128xf32>
      %c16 = arith.constant 16 : index
      %c0_69 = arith.constant 0 : index
      %138 = vector.load %arg15[%c16, %c0_69] : memref<48x128xf32, #tpu.memory_space<vmem>>, vector<16x128xf32>
      tpu.vector_store %arg15[%c16, %c0_69], %137 {strides = array<i32>} : memref<48x128xf32, #tpu.memory_space<vmem>>, vector<16x128xf32>,
      %c0_70 = arith.constant 0 : index
      %c129 = arith.constant 129 : index
      %139 = vector.load %arg14[%c0_70, %c129] : memref<16x384xf32, #tpu.memory_space<vmem>>, vector<16x128xf32>
      %c32 = arith.constant 32 : index
      %c0_71 = arith.constant 0 : index
      %140 = vector.load %arg15[%c32, %c0_71] : memref<48x128xf32, #tpu.memory_space<vmem>>, vector<16x128xf32>
      tpu.vector_store %arg15[%c32, %c0_71], %139 {strides = array<i32>} : memref<48x128xf32, #tpu.memory_space<vmem>>, vector<16x128xf32>,
    } else {
    }
    %c1_i32 = arith.constant 1 : i32
    %74 = arith.cmpi eq, %70, %c1_i32 : i32
    %75 = arith.extui %74 : i1 to i32
    %c0_i32_40 = arith.constant 0 : i32
    %76 = arith.cmpi ne, %75, %c0_i32_40 : i32
    scf.if %76 {
      %c0_64 = arith.constant 0 : index
      %c126 = arith.constant 126 : index
      %135 = vector.load %arg14[%c0_64, %c126] : memref<16x384xf32, #tpu.memory_space<vmem>>, vector<16x128xf32>
      %c0_65 = arith.constant 0 : index
      %c0_66 = arith.constant 0 : index
      %136 = vector.load %arg15[%c0_65, %c0_66] : memref<48x128xf32, #tpu.memory_space<vmem>>, vector<16x128xf32>
      tpu.vector_store %arg15[%c0_65, %c0_66], %135 {strides = array<i32>} : memref<48x128xf32, #tpu.memory_space<vmem>>, vector<16x128xf32>,
      %c0_67 = arith.constant 0 : index
      %c128_68 = arith.constant 128 : index
      %137 = vector.load %arg14[%c0_67, %c128_68] : memref<16x384xf32, #tpu.memory_space<vmem>>, vector<16x128xf32>
      %c16 = arith.constant 16 : index
      %c0_69 = arith.constant 0 : index
      %138 = vector.load %arg15[%c16, %c0_69] : memref<48x128xf32, #tpu.memory_space<vmem>>, vector<16x128xf32>
      tpu.vector_store %arg15[%c16, %c0_69], %137 {strides = array<i32>} : memref<48x128xf32, #tpu.memory_space<vmem>>, vector<16x128xf32>,
      %c0_70 = arith.constant 0 : index
      %c130 = arith.constant 130 : index
      %139 = vector.load %arg14[%c0_70, %c130] : memref<16x384xf32, #tpu.memory_space<vmem>>, vector<16x128xf32>
      %c32 = arith.constant 32 : index
      %c0_71 = arith.constant 0 : index
      %140 = vector.load %arg15[%c32, %c0_71] : memref<48x128xf32, #tpu.memory_space<vmem>>, vector<16x128xf32>
      tpu.vector_store %arg15[%c32, %c0_71], %139 {strides = array<i32>} : memref<48x128xf32, #tpu.memory_space<vmem>>, vector<16x128xf32>,
    } else {
    }
    %c0_41 = arith.constant 0 : index
    %c0_42 = arith.constant 0 : index
    %c0_43 = arith.constant 0 : index
    %77 = vector.load %arg5[%c0_41, %c0_42, %c0_43] : memref<1x16x48xf32, #tpu.memory_space<vmem>>, vector<1x16x48xf32>
    %78 = vector.shape_cast %77 : vector<1x16x48xf32> to vector<16x48xf32>
    %c0_44 = arith.constant 0 : index
    %c0_45 = arith.constant 0 : index
    %79 = vector.load %arg15[%c0_44, %c0_45] : memref<48x128xf32, #tpu.memory_space<vmem>>, vector<48x128xf32>
    %cst_46 = arith.constant dense<0.000000e+00> : vector<16x128xf32>
    %80 = tpu.matmul %78, %79, %cst_46 {dimension_numbers = #tpu.dot_dimension_numbers<[1], [0], [0], [1], [0, 0, 1, 1], [], []>} : vector<16x48xf32>, vector<48x128xf32>, vector<16x128xf32> -> vector<16x128xf32>
    %81 = vector.broadcast %18 : vector<16x1xf32> to vector<16x128xf32>
    %82 = arith.addf %80, %81 : vector<16x128xf32>
    %cst_47 = arith.constant 0.000000e+00 : f32
    %83 = vector.broadcast %cst_47 : f32 to vector<16x128xf32>
    %84 = arith.cmpf oge, %82, %83 : vector<16x128xf32>
    %85 = vector.broadcast %24 : vector<16x1xf32> to vector<16x128xf32>
    %86 = arith.mulf %85, %82 : vector<16x128xf32>
    %87 = arith.select %84, %82, %86 : vector<16x128xi1>, vector<16x128xf32>
    %cst_48 = arith.constant 0.000000e+00 : f32
    %88 = vector.shape_cast %2 : vector<1x128xi1> to vector<1x128xi1>
    %89 = vector.broadcast %88 : vector<1x128xi1> to vector<16x128xi1>
    %90 = vector.broadcast %cst_48 : f32 to vector<16x128xf32>
    %91 = arith.select %89, %87, %90 : vector<16x128xi1>, vector<16x128xf32>
    %92 = vector.shape_cast %91 : vector<16x128xf32> to vector<1x16x128xf32>
    %cst_49 = arith.constant dense<0.000000e+00> : vector<1xf32>
    %93 = vector.multi_reduction <add>, %92, %cst_49 [1, 2] : vector<1x16x128xf32> to vector<1xf32>
    %94 = vector.shape_cast %93 : vector<1xf32> to vector<1x1x1xf32>
    %95 = vector.extract %94[0, 0, 0] : f32 from vector<1x1x1xf32>
    %cst_50 = arith.constant 9.765625E-4 : f32
    %96 = arith.mulf %95, %cst_50 : f32
    %97 = arith.mulf %91, %91 : vector<16x128xf32>
    %98 = vector.shape_cast %97 : vector<16x128xf32> to vector<1x16x128xf32>
    %cst_51 = arith.constant dense<0.000000e+00> : vector<1xf32>
    %99 = vector.multi_reduction <add>, %98, %cst_51 [1, 2] : vector<1x16x128xf32> to vector<1xf32>
    %100 = vector.shape_cast %99 : vector<1xf32> to vector<1x1x1xf32>
    %101 = vector.extract %100[0, 0, 0] : f32 from vector<1x1x1xf32>
    %cst_52 = arith.constant 9.765625E-4 : f32
    %102 = arith.mulf %101, %cst_52 : f32
    %103 = arith.mulf %96, %96 : f32
    %104 = arith.subf %102, %103 : f32
    %cst_53 = arith.constant 0.000000e+00 : f32
    %105 = arith.maximumf %104, %cst_53 : f32
    %cst_54 = arith.constant 9.99999993E-9 : f32
    %106 = arith.addf %105, %cst_54 : f32
    %107 = math.rsqrt %106 : f32
    %108 = vector.broadcast %107 : f32 to vector<16x1xf32>
    %109 = arith.mulf %20, %108 : vector<16x1xf32>
    %110 = vector.broadcast %96 : f32 to vector<16x1xf32>
    %111 = arith.mulf %110, %109 : vector<16x1xf32>
    %112 = arith.subf %22, %111 : vector<16x1xf32>
    %113 = vector.broadcast %109 : vector<16x1xf32> to vector<16x128xf32>
    %114 = arith.mulf %91, %113 : vector<16x128xf32>
    %115 = vector.broadcast %112 : vector<16x1xf32> to vector<16x128xf32>
    %116 = arith.addf %114, %115 : vector<16x128xf32>
    %cst_55 = arith.constant 0.000000e+00 : f32
    %117 = vector.shape_cast %2 : vector<1x128xi1> to vector<1x128xi1>
    %118 = vector.broadcast %117 : vector<1x128xi1> to vector<16x128xi1>
    %119 = vector.broadcast %cst_55 : f32 to vector<16x128xf32>
    %120 = arith.select %118, %116, %119 : vector<16x128xi1>, vector<16x128xf32>
    %c0_56 = arith.constant 0 : index
    %c0_57 = arith.constant 0 : index
    %c0_58 = arith.constant 0 : index
    %121 = vector.load %arg6[%c0_56, %c0_57, %c0_58] : memref<1x16x16xf32, #tpu.memory_space<vmem>>, vector<1x16x16xf32>
    %122 = vector.shape_cast %121 : vector<1x16x16xf32> to vector<16x16xf32>
    %cst_59 = arith.constant dense<0.000000e+00> : vector<16x128xf32>
    %123 = tpu.matmul %122, %120, %cst_59 {dimension_numbers = #tpu.dot_dimension_numbers<[1], [0], [0], [1], [0, 0, 1, 1], [], []>} : vector<16x16xf32>, vector<16x128xf32>, vector<16x128xf32> -> vector<16x128xf32>
    %124 = vector.broadcast %14 : vector<16x1xf32> to vector<16x128xf32>
    %125 = arith.addf %123, %124 : vector<16x128xf32>
    %cst_60 = arith.constant 0.000000e+00 : f32
    %126 = vector.shape_cast %2 : vector<1x128xi1> to vector<1x128xi1>
    %127 = vector.broadcast %126 : vector<1x128xi1> to vector<16x128xi1>
    %128 = vector.broadcast %cst_60 : f32 to vector<16x128xf32>
    %129 = arith.select %127, %125, %128 : vector<16x128xi1>, vector<16x128xf32>
    %130 = arith.addf %6, %129 : vector<16x128xf32>
    %c0_61 = arith.constant 0 : index
    %c0_62 = arith.constant 0 : index
    %131 = vector.load %arg13[%c0_61, %c0_62] : memref<16x128xf32, #tpu.memory_space<vmem>>, vector<16x128xf32>
    tpu.vector_store %arg13[%c0_61, %c0_62], %130 {strides = array<i32>} : memref<16x128xf32, #tpu.memory_space<vmem>>, vector<16x128xf32>,
    %c3_i32 = arith.constant 3 : i32
    %132 = arith.cmpi eq, %arg1, %c3_i32 : i32
    %133 = arith.extui %132 : i1 to i32
    %c0_i32_63 = arith.constant 0 : i32
    %134 = arith.cmpi ne, %133, %c0_i32_63 : i32
    scf.if %134 {
      %c0_64 = arith.constant 0 : index
      %c2_65 = arith.constant 2 : index
      %135 = vector.load %arg9[%c0_64, %c2_65] : memref<16x5xf32, #tpu.memory_space<vmem>>, vector<16x1xf32>
      %c0_66 = arith.constant 0 : index
      %c3_67 = arith.constant 3 : index
      %136 = vector.load %arg9[%c0_66, %c3_67] : memref<16x5xf32, #tpu.memory_space<vmem>>, vector<16x1xf32>
      %c0_68 = arith.constant 0 : index
      %c4_69 = arith.constant 4 : index
      %137 = vector.load %arg9[%c0_68, %c4_69] : memref<16x5xf32, #tpu.memory_space<vmem>>, vector<16x1xf32>
      %cst_70 = arith.constant 0.000000e+00 : f32
      %138 = vector.broadcast %cst_70 : f32 to vector<16x128xf32>
      %139 = arith.cmpf oge, %130, %138 : vector<16x128xf32>
      %140 = vector.broadcast %137 : vector<16x1xf32> to vector<16x128xf32>
      %141 = arith.mulf %140, %130 : vector<16x128xf32>
      %142 = arith.select %139, %130, %141 : vector<16x128xi1>, vector<16x128xf32>
      %cst_71 = arith.constant 0.000000e+00 : f32
      %143 = vector.shape_cast %2 : vector<1x128xi1> to vector<1x128xi1>
      %144 = vector.broadcast %143 : vector<1x128xi1> to vector<16x128xi1>
      %145 = vector.broadcast %cst_71 : f32 to vector<16x128xf32>
      %146 = arith.select %144, %142, %145 : vector<16x128xi1>, vector<16x128xf32>
      %147 = vector.shape_cast %146 : vector<16x128xf32> to vector<1x16x128xf32>
      %cst_72 = arith.constant dense<0.000000e+00> : vector<1xf32>
      %148 = vector.multi_reduction <add>, %147, %cst_72 [1, 2] : vector<1x16x128xf32> to vector<1xf32>
      %149 = vector.shape_cast %148 : vector<1xf32> to vector<1x1x1xf32>
      %150 = vector.extract %149[0, 0, 0] : f32 from vector<1x1x1xf32>
      %cst_73 = arith.constant 9.765625E-4 : f32
      %151 = arith.mulf %150, %cst_73 : f32
      %152 = arith.mulf %146, %146 : vector<16x128xf32>
      %153 = vector.shape_cast %152 : vector<16x128xf32> to vector<1x16x128xf32>
      %cst_74 = arith.constant dense<0.000000e+00> : vector<1xf32>
      %154 = vector.multi_reduction <add>, %153, %cst_74 [1, 2] : vector<1x16x128xf32> to vector<1xf32>
      %155 = vector.shape_cast %154 : vector<1xf32> to vector<1x1x1xf32>
      %156 = vector.extract %155[0, 0, 0] : f32 from vector<1x1x1xf32>
      %cst_75 = arith.constant 9.765625E-4 : f32
      %157 = arith.mulf %156, %cst_75 : f32
      %158 = arith.mulf %151, %151 : f32
      %159 = arith.subf %157, %158 : f32
      %cst_76 = arith.constant 0.000000e+00 : f32
      %160 = arith.maximumf %159, %cst_76 : f32
      %cst_77 = arith.constant 9.99999974E-6 : f32
      %161 = arith.addf %160, %cst_77 : f32
      %162 = math.rsqrt %161 : f32
      %163 = vector.broadcast %162 : f32 to vector<16x1xf32>
      %164 = arith.mulf %135, %163 : vector<16x1xf32>
      %165 = vector.broadcast %151 : f32 to vector<16x1xf32>
      %166 = arith.mulf %165, %164 : vector<16x1xf32>
      %167 = arith.subf %136, %166 : vector<16x1xf32>
      %168 = vector.broadcast %164 : vector<16x1xf32> to vector<16x128xf32>
      %169 = arith.mulf %146, %168 : vector<16x128xf32>
      %170 = vector.broadcast %167 : vector<16x1xf32> to vector<16x128xf32>
      %171 = arith.addf %169, %170 : vector<16x128xf32>
      %cst_78 = arith.constant 0.000000e+00 : f32
      %172 = vector.shape_cast %2 : vector<1x128xi1> to vector<1x128xi1>
      %173 = vector.broadcast %172 : vector<1x128xi1> to vector<16x128xi1>
      %174 = vector.broadcast %cst_78 : f32 to vector<16x128xf32>
      %175 = arith.select %173, %171, %174 : vector<16x128xi1>, vector<16x128xf32>
      %c0_79 = arith.constant 0 : index
      %c0_80 = arith.constant 0 : index
      %176 = vector.load %arg10[%c0_79, %c0_80] : memref<8x16xf32, #tpu.memory_space<vmem>>, vector<8x16xf32>
      %cst_81 = arith.constant dense<0.000000e+00> : vector<8x128xf32>
      %177 = tpu.matmul %176, %175, %cst_81 {dimension_numbers = #tpu.dot_dimension_numbers<[1], [0], [0], [1], [0, 0, 1, 1], [], []>} : vector<8x16xf32>, vector<16x128xf32>, vector<8x128xf32> -> vector<8x128xf32>
      %c0_82 = arith.constant 0 : index
      %c0_83 = arith.constant 0 : index
      %178 = vector.load %arg11[%c0_82, %c0_83] : memref<8x1xf32, #tpu.memory_space<vmem>>, vector<8x1xf32>
      %179 = vector.broadcast %178 : vector<8x1xf32> to vector<8x128xf32>
      %180 = arith.addf %177, %179 : vector<8x128xf32>
      %c0_84 = arith.constant 0 : index
      %c0_85 = arith.constant 0 : index
      %c0_86 = arith.constant 0 : index
      %181 = vector.load %arg12[%c0_84, %c0_85, %c0_86] : memref<1x8x128xf32, #tpu.memory_space<vmem>>, vector<1x8x128xf32>
      %182 = vector.shape_cast %181 : vector<1x8x128xf32> to vector<8x128xf32>
      %183 = vector.shape_cast %180 : vector<8x128xf32> to vector<1x8x128xf32>
      tpu.vector_store %arg12[%c0_84, %c0_85, %c0_86], %183 {strides = array<i32>} : memref<1x8x128xf32, #tpu.memory_space<vmem>>, vector<1x8x128xf32>,
    } else {
    }
    return
  }
  func.func @transform_0(%arg0: i32, %arg1: i32, %arg2: memref<4xi32, #tpu.memory_space<smem>>) -> (i32, i32, i32) {
    %c0_i32 = arith.constant 0 : i32
    %c0_i32_0 = arith.constant 0 : i32
    %c0_i32_1 = arith.constant 0 : i32
    return %arg0, %c0_i32, %c0_i32_0 : i32, i32, i32
  }
  func.func @transform_1(%arg0: i32, %arg1: i32, %arg2: memref<4xi32, #tpu.memory_space<smem>>) -> (i32, i32, i32) {
    %c0_i32 = arith.constant 0 : i32
    %c0_i32_0 = arith.constant 0 : i32
    %c0_i32_1 = arith.constant 0 : i32
    return %arg1, %c0_i32, %c0_i32_0 : i32, i32, i32
  }
  func.func @transform_2(%arg0: i32, %arg1: i32, %arg2: memref<4xi32, #tpu.memory_space<smem>>) -> (i32, i32, i32) {
    %c0_i32 = arith.constant 0 : i32
    %c0_i32_0 = arith.constant 0 : i32
    %c0_i32_1 = arith.constant 0 : i32
    return %arg1, %c0_i32, %c0_i32_0 : i32, i32, i32
  }
  func.func @transform_3(%arg0: i32, %arg1: i32, %arg2: memref<4xi32, #tpu.memory_space<smem>>) -> (i32, i32, i32) {
    %c0_i32 = arith.constant 0 : i32
    %c0_i32_0 = arith.constant 0 : i32
    %c0_i32_1 = arith.constant 0 : i32
    return %arg1, %c0_i32, %c0_i32_0 : i32, i32, i32
  }
  func.func @transform_4(%arg0: i32, %arg1: i32, %arg2: memref<4xi32, #tpu.memory_space<smem>>) -> (i32, i32, i32) {
    %c0_i32 = arith.constant 0 : i32
    %c0_i32_0 = arith.constant 0 : i32
    %c0_i32_1 = arith.constant 0 : i32
    return %arg1, %c0_i32, %c0_i32_0 : i32, i32, i32
  }
  func.func @transform_5(%arg0: i32, %arg1: i32, %arg2: memref<4xi32, #tpu.memory_space<smem>>) -> (i32, i32, i32) {
    %c0_i32 = arith.constant 0 : i32
    %c0_i32_0 = arith.constant 0 : i32
    %c0_i32_1 = arith.constant 0 : i32
    return %arg1, %c0_i32, %c0_i32_0 : i32, i32, i32
  }
  func.func @transform_6(%arg0: i32, %arg1: i32, %arg2: memref<4xi32, #tpu.memory_space<smem>>) -> (i32, i32) {
    %c0_i32 = arith.constant 0 : i32
    %c0_i32_0 = arith.constant 0 : i32
    %c0_i32_1 = arith.constant 0 : i32
    return %c0_i32, %c0_i32_0 : i32, i32
  }
  func.func @transform_7(%arg0: i32, %arg1: i32, %arg2: memref<4xi32, #tpu.memory_space<smem>>) -> (i32, i32) {
    %c0_i32 = arith.constant 0 : i32
    %c0_i32_0 = arith.constant 0 : i32
    %c0_i32_1 = arith.constant 0 : i32
    return %c0_i32, %c0_i32_0 : i32, i32
  }
  func.func @transform_8(%arg0: i32, %arg1: i32, %arg2: memref<4xi32, #tpu.memory_space<smem>>) -> (i32, i32) {
    %c0_i32 = arith.constant 0 : i32
    %c0_i32_0 = arith.constant 0 : i32
    %c0_i32_1 = arith.constant 0 : i32
    return %c0_i32, %c0_i32_0 : i32, i32
  }
  func.func @transform_9(%arg0: i32, %arg1: i32, %arg2: memref<4xi32, #tpu.memory_space<smem>>) -> (i32, i32, i32) {
    %c0_i32 = arith.constant 0 : i32
    %c0_i32_0 = arith.constant 0 : i32
    %c0_i32_1 = arith.constant 0 : i32
    return %arg0, %c0_i32, %c0_i32_0 : i32, i32, i32
  }
}

</mosaic_0001>

<bundles_post_ra>
// kernel: tpu_custom_call.1
= control target key start
LH: loop header
LB: loop body
LE: loop exit
PB: predicated region body
PF: predicated region fallthrough
CT: control target
= control target key end

     0   :  { %s2536_s0 = inlined_call_operand.hbm [shape: s32[4], index: 0, kind: input, shape index: {}]   ;;  %s2537_s1 = inlined_call_operand.hbm [shape: f32[2,16,128], index: 1, kind: input, shape index: {}]   ;;  %s2538_s2 = inlined_call_operand.vmem [shape: f32[4,16,16], index: 2, kind: input, shape index: {}]   ;;  %s2539_s3 = inlined_call_operand.vmem [shape: f32[4,16,48], index: 3, kind: input, shape index: {}]   ;;  %s2540_s4 = inlined_call_operand.vmem [shape: f32[4,16,16], index: 4, kind: input, shape index: {}]   ;;  %s2541_s5 = inlined_call_operand.vmem [shape: f32[4,16,5], index: 5, kind: input, shape index: {}]   ;;  %s2542_s6 = inlined_call_operand.vmem [shape: f32[4,16,4], index: 6, kind: input, shape index: {}]   ;;  %s2543_s7 = inlined_call_operand.vmem [shape: f32[16,5], index: 7, kind: input, shape index: {}]   ;;  %s2544_s8 = inlined_call_operand.hbm [shape: f32[8,16], index: 8, kind: input, shape index: {}]   ;;  %s2545_s9 = inlined_call_operand.vmem [shape: f32[8,1], index: 9, kind: input, shape index: {}]   ;;  %s2546_s10 = inlined_call_operand.hbm [shape: f32[2,8,128], index: 10, kind: output, shape index: {}]  }
   0x1   :  { %2561 = sst [smem:[#allocation24_spill]] %s2537_s1  ;;  %s1807_s15 = scalar_lea.hbm %s2536_s0, 16 }
   0x2   :  { %2562 = sst [smem:[#allocation25_spill]] %s2538_s2  ;;  %p1808_p0 = scmp.ne.s32.totalorder %s2536_s0, %s1807_s15 }
   0x3   :  { %2563 = sst [smem:[#allocation26_spill]] %s2539_s3  ;;  %p1811_p1 = scmp.lt.u32.totalorder %s1807_s15, %s2536_s0 }
   0x4   :  { %2564 = sst [smem:[#allocation27_spill]] %s2540_s4 }
   0x5   :  { %2565 = sst [smem:[#allocation28_spill]] %s2544_s8  ;;  %p1813_p2 = pnand %p1811_p1, %p1808_p0 }
   0x6   :  { %2566 = sst [smem:[#allocation29_spill]] %s2546_s10 }
   0x7   :  { %1816 = shalt.err (!%p1813_p2)  }
   0x8   :  { %s1981_s20 = smov [#allocation6]  }
   0x9   :  { %16 = dma.hbm_to_smem %s2536_s0, 16, %s1981_s20, [#allocation5] }
   0xa   :  { %1935 = dma.done.wait [#allocation5], 16 }
   0xb   :  { %1936 = vsyncadd [#allocation5], 4294967280 }
   0xc   :  { %18 = sfence }
   0xd   :  { %19 = vsyncpa [#allocation8], 0 }
   0xe   :  { %21 = vsyncpa [#allocation8 + $0x1], 0 }
   0xf   :  { %22 = vsyncpa [#allocation11], 0 }
  0x10   :  { %23 = vsyncpa [#allocation9], 0 }
  0x11   :  { %25 = vsyncpa [#allocation9 + $0x1], 0  ;;  %s2079_s23 = smov 0   ;;  %s2081_s24 = smov 0  }
  0x12   :  { %s2083_s25 = smov 0   ;;  %s2085_s26 = smov 0  }
  0x13   :  { %s2087_s27 = smov 0   ;;  %s2089_s28 = smov 0  }
  0x14   :  { %s2091_s0 = smov 0   ;;  %s2093_s29 = smov 0  }
  0x15 LB: > { %2567 = sst [smem:[#allocation17_spill]] %s1951_s23  ;;  %s1506_s30 = sadd.s32 4294967295, %s1979_s29   ;;  %s1979_s29 = sphi %s2093_s29, %s31_s29   ;;  %s1975_s0 = sphi %s2091_s0, %s2604_s0   ;;  %s1971_s28 = sphi %s2089_s28, %s2603_s28   ;;  %s1967_s27 = sphi %s2087_s27, %s2602_s27   ;;  %s1963_s26 = sphi %s2085_s26, %s2601_s26   ;;  %s1959_s25 = sphi %s2083_s25, %s2607_s25   ;;  %s1955_s24 = sphi %s2081_s24, %s2606_s24   ;;  %s1951_s23 = sphi %s2079_s23, %s2605_s23  }
  0x16   : > { %2568 = sst [smem:[#allocation18_spill]] %s1971_s28  ;;  %s1507_s11 = sadd.s32 4294967294, %s1979_s29  }
  0x17   : > { %2569 = sst [smem:[#allocation19_spill]] %s1975_s0  ;;  %p57_p3 = scmp.ne.s32.totalorder %s1959_s25, %s1955_s24 }
  0x18   : > { %2570 = sst [smem:[#allocation20_spill]] %s1979_s29  ;;  %p58_p4 = scmp.eq.s32.totalorder %s1979_s29, 0 }
  0x19   : > { %p63_p5 = scmp.ne.s32.totalorder %s1955_s24, %s1951_s23  ;;  %p2127_p6 = scmp.eq.s32.totalorder %s1506_s30, 0 }
  0x1a   : > { %p280_p7 = scmp.eq.s32.totalorder %s1506_s30, 7  ;;  %p2131_p8 = por %p58_p4, %p57_p3 }
  0x1b   : > { %s2571_s13 = scalar_select %p2127_p6, 1, 0 }
  0x1c   : > { %p286_p9 = scmp.eq.s32.totalorder %s1507_s11, 7  ;;  %p2137_p10 = por %p2127_p6, %p63_p5 }
  0x1d   : > { %p2141_p11 = por %p280_p7, %p57_p3  ;;  %p1508_p13 = scmp.ge.s32.totalorder %s1979_s29, 1 }
  0x1e   : > { %s2573_s15 = scalar_select %p2137_p10, 1, 0 }
  0x1f   : > { %s2574_s16 = scalar_select %p2141_p11, 1, 0 }
  0x20   : > { %p2145_p12 = por %p286_p9, %p63_p5  ;;  %p293_p0 = scmp.lt.s32.totalorder %s1979_s29, 9 }
  0x21   : > { %s1982_s19 = smov [#allocation10]   ;;  %p1679_p2 = scmp.lt.s32.totalorder %s1979_s29, 8 }
  0x22   : > { %s2575_s17 = scalar_select %p2145_p12, 1, 0 }
  0x23   : > { %p2151_p1 = pnand %p1508_p13, %p293_p0  ;;  %s309_s20 = sshll.u32 %s1982_s19, 4  ;;  %s310_s20 = int_to_ptr.vmem [resolvable:$true] %s309_s20 }
  0x24   : > { %2576 = sst [smem:[#allocation21_spill]] %s2575_s17  ;;  %p2160_p4 = pnand %p1679_p2, %p2131_p8 }
  0x25   : > { %s2577_s18 = scalar_select %p2151_p1, 1, 0 }
  0x26   : > { %p1666_p3 = pneg %p2151_p1  ;;  %s40_s30 = sadd.s32 1, %s1971_s28 }
  0x27   : > { %s2578_s21 = scalar_select %p2160_p4, 1, 0 }
  0x28   : > { %p2166_p5 = pnand %p1666_p3, %p2127_p6  ;;  %s2580_s8 = sld [smem:[#allocation28_spill]] }
  0x2a   : > { %p1819_p8 = pneg %p2166_p5 }
  0x2e   : > { %s1817_s19 = scalar_lea.hbm %s2580_s8, 128 }
  0x2f   : > { %p1818_p7 = scmp.ne.s32.totalorder %s2580_s8, %s1817_s19  ;;  %p1824_p0 = scmp.lt.u32.totalorder %s1817_s19, %s2580_s8 }
  0x31   : > { %p1820_p9 = pnand %p1819_p8, %p1818_p7 }
  0x33   : > { %p1821_p13 = pneg %p1820_p9 }
  0x35   : > { %p1826_p2 = pnand %p1824_p0, %p1821_p13 }
  0x37   : > { %1829 = shalt.err (!%p1826_p2)
}
  0x38   : > { %s1830_s10 = scalar_lea.vmem %s310_s20, 128  ;;  %p1838_p6 = scmp.lt.s32.totalorder %s310_s20, %s310_s20 }
  0x39   : > { %p1831_p3 = scmp.ne.s32.totalorder %s310_s20, %s1830_s10  ;;  %p1839_p10 = scmp.lt.s32.totalorder %s1830_s10, %s1830_s10 }
  0x3b   : > { %p1833_p12 = pnand %p1831_p3, %p1819_p8  ;;  %p1840_p1 = por %p1839_p10, %p1838_p6 }
  0x3d   : > { %p1834_p11 = pneg %p1833_p12 }
  0x3f   : > { %p1841_p4 = pnand %p1840_p1, %p1834_p11 }
  0x41   : > { %1844 = shalt.err (!%p1841_p4)
}
  0x42   : > { %1669 = dma.hbm_to_vmem [thread:$0]  (!%p2166_p5), %s2580_s8, 128, %s310_s20, [#allocation11]  }
  0x43   : > { %p41_p7 = scmp.ge.s32.totalorder %s40_s30, 4  ;;  %s43_s29 = sadd.s32 1, %s1975_s0 }
  0x44   : > { %s323_s17 = sand.u32 1, %s1959_s25   ;;  %s1547_s11 = sshll.u32 %s1975_s0, 8 }
  0x45   : > { %s2609_s30 = smov (%p41_p7, %s40_s30), 0  ;;  %s2611_s29 = smov (!%p41_p7, %s43_s29), %s1975_s0 }
  0x46   : > { %2581 = sst [smem:[#allocation22_spill]] %s2609_s30  ;;  %s1511_s10 = sshll.u32 %s323_s17, 4 }
  0x47   : > { %p45_p6 = scmp.ge.s32.totalorder %s2611_s29, 2  ;;  %s2582_s1 = sld [smem:[#allocation24_spill]] }
  0x48   : > { %s327_s20 = scalar_lea.vmem [#allocation7], %s1511_s10  ;;  %s2208_s30 = scalar_lea.sflag [#allocation8], %s323_s17 }
  0x49   : > { %s334_s23 = sshll.u32 %s327_s20, 4  ;;  %s2613_s29 = smov (%p45_p6, %s2611_s29), 0  ;;  %s2200_s23 = int_to_ptr.vmem [resolvable:$true] %s334_s23 }
  0x4a   : > { %2583 = sst [smem:[#allocation23_spill]] %s2613_s29  ;;  %s47_s12 = ssub.s32 %s1975_s0, %s2613_s29 }
  0x4b   : > { %p2204_p10 = scmp.eq.s32.totalorder %s47_s12, 0  ;;  %p2585_p12 = scmp.ne.s32.totalorder %s2578_s21, 0 }
  0x4d   : > { %s2196_s14 = scalar_lea.hbm %s2582_s1, %s1547_s11  ;;  %p1847_p1 = pneg %p2585_p12 }
  0x4e   : > { %s1845_s11 = scalar_lea.hbm %s2196_s14, 256  ;;  %s1850_s19 = scalar_lea.hbm %s2582_s1, 512 }
  0x4f   : > { %p1846_p11 = scmp.ne.s32.totalorder %s2196_s14, %s1845_s11  ;;  %p1851_p8 = scmp.lt.u32.totalorder %s2196_s14, %s2582_s1 }
  0x50   : > { %p1852_p9 = scmp.lt.u32.totalorder %s1850_s19, %s1845_s11  ;;  %p1854_p0 = scmp.lt.u32.totalorder %s1845_s11, %s2196_s14 }
  0x51   : > { %p1848_p4 = pnand %p1847_p1, %p1846_p11 }
  0x52   : > { %p1853_p13 = por %p1852_p9, %p1851_p8 }
  0x53   : > { %p1849_p5 = pneg %p1848_p4 }
  0x54   : > { %p1855_p2 = por %p1854_p0, %p1853_p13 }
  0x56   : > { %p1856_p3 = pnand %p1855_p2, %p1849_p5 }
  0x58   : > { %1859 = shalt.err (!%p1856_p3)
}
  0x59   : > { %s1860_s17 = scalar_lea.vmem %s2200_s23, 256  ;;  %s1983_s12 = smov [#allocation7]  }
  0x5a   : > { %p1861_p7 = scmp.ne.s32.totalorder %s2200_s23, %s1860_s17  ;;  %s1865_s10 = sshll.u32 %s1983_s12, 4  ;;  %s1866_s10 = int_to_ptr.vmem [resolvable:$false] %s1865_s10 }
  0x5b   : > { %s1867_s29 = scalar_lea.vmem %s1866_s10, 512  ;;  %p1868_p4 = scmp.lt.s32.totalorder %s2200_s23, %s1866_s10 }
  0x5c   : > { %p1863_p6 = pnand %p1861_p7, %p1847_p1  ;;  %p1869_p8 = scmp.lt.s32.totalorder %s1867_s29, %s1860_s17 }
  0x5e   : > { %p1864_p11 = pneg %p1863_p6  ;;  %p1870_p9 = por %p1869_p8, %p1868_p4 }
  0x60   : > { %p1871_p13 = pnand %p1870_p9, %p1864_p11 }
  0x62   : > { %1874 = shalt.err (!%p1871_p13)
}
  0x63   : > { %s1984_s11 = smov 128   ;;  %s1985_s22 = smov 8  }
  0x64   : > { %1673 = dma.hbm_to_vmem [thread:$0]  (!%p2585_p12), %s2196_s14, 256, %s2200_s23, %s2208_s30, %s1984_s11, %s1984_s11, %s1985_s22  }
  0x65   : > { %s2586_s19 = sadd.s32 1, %s1959_s25  ;;  %p2587_p1 = scmp.ne.s32.totalorder %s2577_s18, 0 }
  0x66   : > { %s2241_s20 = scalar_select %p2204_p10, %s1959_s25, %s2586_s19  }
  0x67   : > { %386 = sbr.rel (%p2587_p1) target bundleno = 3582 (0xdfe), region = 56  ;;  %s2246_s17 = sand.u32 (!%p2587_p1), 1, %s1955_s24  }
  0x68   : > { %s1515_s12 = sshll.u32 (!%p2587_p1), %s2246_s17, 4  ;;  %s389_s10 = scalar_lea.sflag (!%p2587_p1), [#allocation8], %s2246_s17 }
  0x69   : > { %s392_s29 = scalar_lea.vmem (!%p2587_p1), [#allocation7], %s1515_s12  ;;  %p2588_p5 = scmp.ne.s32.totalorder (!%p2587_p1), %s2573_s15, 0 }
  0x6e   : > { %1938 = dma.done.wait (%p2588_p5), %s389_s10, 256  }
  0x6f   : > { %1940 = vsyncadd (%p2588_p5), %s389_s10, 4294967040  ;;  %p2589_p10 = scmp.ne.s32.totalorder %s2571_s13, 0 }
  0x71   : > { %1942 = dma.done.wait (%p2589_p10), [#allocation11], 128  }
  0x72   : > { %1944 = vsyncadd (%p2589_p10), [#allocation11], 4294967168  ;;  %s1517_s8 = sshll.u32 %s2246_s17, 3  ;;  %p456_p12 = scmp.lt.s32.totalorder %s1963_s26, 3  ;;  %v481_v0 = vlaneseq }
  0x73   : > { %s2590_s2 = sld [smem:[#allocation25_spill]]  ;;  %s2591_s3 = sld [smem:[#allocation26_spill]] }
  0x74   : > { %s457_s18 = scalar_select %p456_p12, %s1963_s26, 3  ;;  %v2261_v1 = vand.u32 127, %v481_v0 }
  0x75   : > { %s2592_s4 = sld [smem:[#allocation27_spill]]  ;;  %s2289_s30 = scalar_lea.vmem [#allocation12], %s1517_s8 }
  0x76   : > { %s1548_s21 = sshll.u32 %s457_s18, 4  ;;  %vm483_vm0 = vcmp.lt.s32.totalorder %v2261_v1, 64  ;;  %p1528_p0 = scmp.ne.s32.totalorder %s1963_s26, 0 }
  0x77   : > { %s2282_s18 = scalar_lea.vmem %s2541_s5, %s1548_s21  ;;  %s2287_s15 = scalar_lea.vmem %s2542_s6, %s1548_s21  ;;  %v490_v2 = vld [vmem:[%s392_s29] sm:$0xff] (!%p1528_p0)  ;;  %v491_v3 = vld [vmem:[%s392_s29 + $0x8] sm:$0xff] (!%p1528_p0)  ;;  %v1986_v20 = vmov (!%p1528_p0), 0   ;;  %v1989_v35 = vmov (!%p1528_p0), 1   ;;  %v1990_v40 = vmov (!%p1528_p0), 0.0  }
  0x78   : > { %487 = sbr.rel (%p1528_p0) target bundleno = 658 (0x292), region = 68  ;;  %v2294_v4 = vsel (!%p1528_p0), %vm483_vm0, %v490_v2, 0.0  ;;  %v2298_v5 = vsel (!%p1528_p0), %vm483_vm0, %v491_v3, 0.0  ;;  %1775 = vset.pattern.permute.xlu0 (!%p1528_p0), %v1986_v20  ;;  %1776 = vset.pattern.permute.xlu1 (!%p1528_p0), %v1986_v20  ;;  %s1987_s23 = smov (!%p1528_p0), 0.0   ;;  %v488_v27 = vld [vmem:[%s2543_s7] sm:$0xff] (!%p1528_p0)  ;;  %v489_v28 = vld [vmem:[%s2543_s7 + $0x8] sm:$0xff] (!%p1528_p0) }
  0x79   : > { %s2267_s14 = scalar_lea.vmem %s2590_s2, %s1548_s21  ;;  %s2272_s11 = scalar_lea.vmem %s2591_s3, %s1548_s21  ;;  %v496_v6 = vadd.f32 (!%p1528_p0), %v2298_v5, %v2294_v4  ;;  %v507_v7 = vmul.f32 (!%p1528_p0), %v2294_v4, %v2294_v4  ;;  %v508_v8 = vmul.f32 (!%p1528_p0), %v2298_v5, %v2298_v5  ;;  %571 = vst [vmem:[#allocation3] sm:$0xff] (!%p1528_p0), %v1990_v40  ;;  %572 = vst [vmem:[#allocation3 + $0x18] sm:$0xff] (!%p1528_p0), %v1990_v40 }
  0x7a   : > { %573 = vst [vmem:[#allocation3 + $0x10] sm:$0xff] (!%p1528_p0), %v1990_v40  ;;  %574 = vst [vmem:[#allocation3 + $0x28] sm:$0xff] (!%p1528_p0), %v1990_v40 }
  0x7b   : > { %s2277_s12 = scalar_lea.vmem %s2592_s4, %s1548_s21  ;;  %497 = vadd.xlane.f32.xlu0 (!%p1528_p0), %v496_v6  ;;  %v509_v9 = vadd.f32 (!%p1528_p0), %v508_v8, %v507_v7 }
  0x7f   : > { %510 = vadd.xlane.f32.xlu0 %v509_v9 }
 0x108   : > { %v498_v10 = vpop.xlane.xlu0 %497 }
 0x109   : > { %v499_v11 = vrot.slane %v498_v10, 4 }
 0x10b   : > { %v500_v12 = vadd.f32 %v499_v11, %v498_v10 }
 0x10c   : > { %v511_v13 = vpop.xlane.xlu0 %510 }
 0x10d   : > { %v501_v14 = vrot.slane %v500_v12, 2  ;;  %v512_v15 = vrot.slane %v511_v13, 4 }
 0x10f   : > { %v513_v16 = vadd.f32 %v512_v15, %v511_v13  ;;  %v502_v17 = vadd.f32 %v501_v14, %v500_v12 }
 0x111   : > { %v514_v18 = vrot.slane %v513_v16, 2  ;;  %v503_v19 = vrot.slane %v502_v17, 1 }
 0x113   : > { %v504_v21 = vadd.f32 %v503_v19, %v502_v17  ;;  %v515_v22 = vadd.f32 %v514_v18, %v513_v16 }
 0x115   : > { %1634 = vpush %v504_v21  ;;  %v516_v23 = vrot.slane %v515_v22, 1 }
 0x117   : > { %v517_v24 = vadd.f32 %v516_v23, %v515_v22 }
 0x119   : > { %1636 = vpush %v517_v24 }
 0x146   : > { %s1635_s1 = spop %1634 }
 0x147   : > { %s506_s28 = smul.f32 0.0009765625, %s1635_s1  ;;  %s1988_s1 = smov 1  }
 0x149   : > { %s520_s0 = smul.f32 %s506_s28, %s506_s28  ;;  %v530_v31 = vstv %s506_s28 }
 0x14a   : > { %s1637_s29 = spop %1636 }
 0x14b   : > { %s519_s8 = smul.f32 0.0009765625, %s1637_s29 }
 0x14d   : > { %s521_s21 = ssub.f32 %s519_s8, %s520_s0 }
 0x14f   : > { %s522_s13 = smax.f32 %s1987_s23, %s521_s21 }
 0x150   : > { %s523_s22 = sadd.f32 1e-08, %s522_s13 }
 0x152   : > { %v524_v25 = vstv %s523_s22 }
 0x153   : > { %1779 = vrsqrt.f32 %v524_v25 }
 0x15d   : > { %v1780_v26 = vpop.eup %1779 }
 0x15e   : > { %1638 = vpush %v1780_v26 }
 0x18f   : > { %s1639_s2 = spop %1638 }
 0x190   : > { %v527_v29 = vstv %s1639_s2 }
 0x191   : > { %v528_v30 = vmul.f32 %v527_v29, %v488_v27  ;;  %v529_v32 = vmul.f32 %v527_v29, %v489_v28 }
 0x193   : > { %545 = vperm.xlu0 %1775, %v528_v30   ;;  %v531_v33 = vmul.f32 %v530_v31, %v528_v30  ;;  %v532_v34 = vmul.f32 %v530_v31, %v529_v32 }
 0x195   : > { %535 = vrot.lane.b32.xlu1 %v531_v33, %s1988_s1 }
 0x197   : > { %1778 = vset.pattern.permute.xlu0 %v1989_v35 }
 0x199   : > { %537 = vrot.lane.b32.xlu1 %v532_v34, %s1988_s1 }
 0x19d   : > { %550 = vperm.xlu1 %1776, %v529_v32  }
 0x1a1   : > { %1777 = vset.pattern.permute.xlu1 %v1989_v35 }
 0x207   : > { %v536_v36 = vpop.permute.xlu1 %535 }
 0x208   : > { %v541_v37 = vsub.f32 %v488_v27, %v536_v36 }
 0x20a   : > { %557 = vperm.xlu1 %1777, %v541_v37  }
 0x20b   : > { %v538_v38 = vpop.permute.xlu1 %537 }
 0x20c   : > { %v542_v39 = vsub.f32 %v489_v28, %v538_v38 }
 0x20e   : > { %562 = vperm.xlu1 %1777, %v542_v39  }
 0x212   : > { %v546_v41 = vpop.permute.xlu0 %545 }
 0x213   : > { %v553_v43 = vmul.f32 %v546_v41, %v2294_v4 }
 0x21c   : > { %v551_v42 = vpop.permute.xlu1 %550 }
 0x21d   : > { %v554_v46 = vmul.f32 %v551_v42, %v2298_v5 }
 0x289   : > { %v558_v44 = vpop.permute.xlu1 %557 }
 0x28a   : > { %v565_v45 = vadd.f32 %v558_v44, %v553_v43 }
 0x28c   : > { %v567_v47 = vsel %vm483_vm0, %v565_v45, 0.0 }
 0x28d   : > { %569 = vst [vmem:[#allocation2] sm:$0xff] %v567_v47  ;;  %v563_v48 = vpop.permute.xlu1 %562 }
 0x28e   : > { %v566_v49 = vadd.f32 %v563_v48, %v554_v46 }
 0x290   : > { %v568_v50 = vsel %vm483_vm0, %v566_v49, 0.0 }
 0x291   : > { %570 = vst [vmem:[#allocation2 + $0x8] sm:$0xff] %v568_v50 }
 0x292 PF: > { %v2323_v53 = vld [vmem:[%s2287_s15] sm:$0xff]  ;;  %vm593_vm1 = vcmask 130048   ;;  %v2326_v54 = vld [vmem:[%s2287_s15 + $0x8] sm:$0xff]  ;;  %v1991_v57 = vmov 0   ;;  %v1992_v58 = vmov 4   ;;  %v1993_v31 = vmov 1  }
 0x293   : > { %v581_v56 = vld [vmem:[%s2267_s14] sm:$0xff]  ;;  %1781 = vset.pattern.permute.xlu0 %v1991_v57  ;;  %1782 = vset.pattern.permute.xlu1 %v1992_v58  ;;  %v582_v60 = vld [vmem:[%s2267_s14 + $0x8] sm:$0xff]  ;;  %s1994_s28 = smov 0.0   ;;  %s1995_s21 = smov 1   ;;  %v1996_v40 = vmov 2  }
 0x294   : > { %v2318_v51 = vld [vmem:[#allocation2] sm:$0xff]  ;;  %1576 = vmatprep.mubr.msk.f32.mxu0 %vm593_vm1, %v581_v56  ;;  %v2340_v61 = vld [vmem:[%s2282_s18 + $0x8] sm:$0xff]  ;;  %s2371_s23 = sld [smem:[#allocation6 + %s1963_s26]] }
 0x295   : > { %v2334_v59 = vld [vmem:[%s2282_s18] sm:$0xff] }
 0x296   : > { %585 = vperm.xlu0 %1781, %v2334_v59   ;;  %678 = vperm.xlu1 %1782, %v2334_v59  }
 0x298   : > { %v2320_v52 = vld [vmem:[#allocation2 + $0x8] sm:$0xff] }
 0x299   : > { %v1608_v55 = vpack.c.bf16 %v2320_v52, %v2318_v51 }
 0x29a   : > { %590 = vperm.xlu0 %1781, %v2340_v61   ;;  %682 = vperm.xlu1 %1782, %v2340_v61   ;;  %p1531_p2 = scmp.ne.s32.totalorder %s2371_s23, 0 }
 0x29b   : > { %1609 = vmatprep.subr.bf16.mxu0 %v1608_v55  ;;  %s1997_s13 = smov (!%p1531_p2), 1   ;;  %s1998_s22 = smov (!%p1531_p2), 127   ;;  %vm789_vm4 = vcmask (!%p1531_p2), 7168   ;;  %vm816_vm5 = vcmask (!%p1531_p2), 1039360  }
 0x29c   : > { %1611 = vmatpush3.bf16.msra.mxu0 %v1608_v55 }
 0x29e   : > { %1784 = vset.pattern.permute.xlu1 %v1993_v31  ;;  %1783 = vset.pattern.permute.xlu0 %v1993_v31 }
 0x29f   : > { %1577 = vmatmul.mubr.msk.f32.vlgmr.msra.gmra.mrb[0].mxu0 %vm593_vm1, %v582_v60 }
 0x315   : > { %v586_v62 = vpop.permute.xlu0 %585  ;;  %v679_v63 = vpop.permute.xlu1 %678 }
 0x319   : > { %v591_v0 = vpop.permute.xlu0 %590  ;;  %v683_v5 = vpop.permute.xlu1 %682 }
 0x372   : > { %v1578_v2 = vpop.f32.mrb[0].mxu0 }
 0x373   : > { %v672_v3 = vadd.f32 %v1578_v2, %v591_v0  ;;  %v666_v4 = vpop.f32.mrb[1].mxu0 }
 0x374   : > { %v667_v6 = vadd.f32 %v666_v4, %v586_v62  ;;  %v775_v62 = vld [vmem:[#allocation3 + $0x18] sm:$0xff] (!%p1531_p2)  ;;  %v803_v4 = vld [vmem:[#allocation3 + $0x28] sm:$0xff] (!%p1531_p2) }
 0x375   : > { %vm676_vm2 = vcmp.ge.f32.partialorder %v672_v3, 0.0  ;;  %v686_v7 = vmul.f32 %v683_v5, %v672_v3 }
 0x376   : > { %vm675_vm3 = vcmp.ge.f32.partialorder %v667_v6, 0.0  ;;  %v685_v8 = vmul.f32 %v679_v63, %v667_v6  ;;  %v773_v63 = vld [vmem:[#allocation3] sm:$0xff] (!%p1531_p2) }
 0x377   : > { %v688_v9 = vsel %vm676_vm2, %v672_v3, %v686_v7  ;;  %v801_v3 = vld [vmem:[#allocation3 + $0x10] sm:$0xff] (!%p1531_p2) }
 0x378   : > { %v687_v10 = vsel %vm675_vm3, %v667_v6, %v685_v8  ;;  %v2347_v11 = vsel %vm483_vm0, %v688_v9, 0.0 }
 0x379   : > { %v2351_v12 = vsel %vm483_vm0, %v687_v10, 0.0  ;;  %v705_v13 = vmul.f32 %v2347_v11, %v2347_v11 }
 0x37a   : > { %v693_v14 = vadd.f32 %v2347_v11, %v2351_v12  ;;  %v704_v15 = vmul.f32 %v2351_v12, %v2351_v12 }
 0x37c   : > { %694 = vadd.xlane.f32.xlu0 %v693_v14  ;;  %v706_v16 = vadd.f32 %v705_v13, %v704_v15 }
 0x37e   : > { %707 = vadd.xlane.f32.xlu1 %v706_v16 }
 0x409   : > { %v695_v17 = vpop.xlane.xlu0 %694 }
 0x40a   : > { %v696_v18 = vrot.slane %v695_v17, 4 }
 0x40b   : > { %v708_v19 = vpop.xlane.xlu1 %707 }
 0x40c   : > { %v697_v20 = vadd.f32 %v696_v18, %v695_v17  ;;  %v709_v21 = vrot.slane %v708_v19, 4 }
 0x40e   : > { %v698_v22 = vrot.slane %v697_v20, 2  ;;  %v710_v23 = vadd.f32 %v709_v21, %v708_v19 }
 0x410   : > { %v711_v24 = vrot.slane %v710_v23, 2  ;;  %v699_v25 = vadd.f32 %v698_v22, %v697_v20 }
 0x412   : > { %v700_v26 = vrot.slane %v699_v25, 1  ;;  %v712_v27 = vadd.f32 %v711_v24, %v710_v23 }
 0x414   : > { %v701_v28 = vadd.f32 %v700_v26, %v699_v25  ;;  %v713_v29 = vrot.slane %v712_v27, 1 }
 0x416   : > { %1640 = vpush %v701_v28  ;;  %v714_v30 = vadd.f32 %v713_v29, %v712_v27 }
 0x418   : > { %1642 = vpush %v714_v30 }
 0x447   : > { %s1641_s2 = spop %1640 }
 0x448   : > { %s703_s3 = smul.f32 0.0009765625, %s1641_s2 }
 0x449   : > { %s1643_s4 = spop %1642 }
 0x44a   : > { %s717_s14 = smul.f32 %s703_s3, %s703_s3  ;;  %v727_v37 = vstv %s703_s3 }
 0x44b   : > { %s716_s18 = smul.f32 0.0009765625, %s1643_s4 }
 0x44d   : > { %s718_s15 = ssub.f32 %s716_s18, %s717_s14 }
 0x44f   : > { %s719_s0 = smax.f32 %s1994_s28, %s718_s15 }
 0x450   : > { %s720_s29 = sadd.f32 1e-08, %s719_s0 }
 0x452   : > { %v721_v32 = vstv %s720_s29 }
 0x453   : > { %1787 = vrsqrt.f32 %v721_v32 }
 0x45d   : > { %v1788_v33 = vpop.eup %1787 }
 0x45e   : > { %1644 = vpush %v1788_v33 }
 0x48f   : > { %s1645_s8 = spop %1644 }
 0x490   : > { %v724_v34 = vstv %s1645_s8 }
 0x491   : > { %v725_v35 = vmul.f32 %v724_v34, %v2334_v59  ;;  %v726_v36 = vmul.f32 %v724_v34, %v2340_v61 }
 0x493   : > { %v728_v38 = vmul.f32 %v727_v37, %v725_v35  ;;  %v729_v39 = vmul.f32 %v727_v37, %v726_v36 }
 0x495   : > { %734 = vrot.lane.b32.xlu1 %v729_v39, %s1995_s21  ;;  %732 = vrot.lane.b32.xlu0 %v728_v38, %s1995_s21 }
 0x499   : > { %747 = vperm.xlu1 %1784, %v726_v36   ;;  %742 = vperm.xlu0 %1783, %v725_v35  }
 0x49d   : > { %1785 = vset.pattern.permute.xlu1 %v1996_v40  ;;  %1786 = vset.pattern.permute.xlu0 %v1996_v40 }
 0x507   : > { %v735_v41 = vpop.permute.xlu1 %734  ;;  %v733_v42 = vpop.permute.xlu0 %732 }
 0x508   : > { %v739_v43 = vsub.f32 %v2340_v61, %v735_v41  ;;  %v738_v44 = vsub.f32 %v2334_v59, %v733_v42 }
 0x50a   : > { %759 = vperm.xlu0 %1786, %v739_v43   ;;  %754 = vperm.xlu1 %1785, %v738_v44  }
 0x50e   : > { %785 = vrot.lane.b32.xlu1 (!%p1531_p2), %v775_v62, %s1997_s13  ;;  %781 = vrot.lane.b32.xlu0 (!%p1531_p2), %v773_v63, %s1997_s13 }
 0x518   : > { %v748_v45 = vpop.permute.xlu1 %747  ;;  %v743_v46 = vpop.permute.xlu0 %742 }
 0x519   : > { %v751_v47 = vmul.f32 %v748_v45, %v2347_v11  ;;  %v750_v48 = vmul.f32 %v743_v46, %v2351_v12 }
 0x587   : > { %772 = sbr.rel (%p1531_p2) target bundleno = 1554 (0x612), region = 72 }
 0x589   : > { %v755_v49 = vpop.permute.xlu1 %754  ;;  %v760_v50 = vpop.permute.xlu0 %759 }
 0x58a   : > { %v762_v55 = vadd.f32 %v755_v49, %v750_v48  ;;  %v763_v56 = vadd.f32 %v760_v50, %v751_v47 }
 0x58c   : > { %v764_v58 = vsel %vm483_vm0, %v762_v55, 0.0  ;;  %v765_v60 = vsel %vm483_vm0, %v763_v56, 0.0 }
 0x58d   : > { %766 = vst [vmem:[#allocation3 + $0x8] sm:$0xff] %v764_v58  ;;  %767 = vst [vmem:[#allocation3 + $0x20] sm:$0xff] %v765_v60  ;;  %v786_v5 = vpop.permute.xlu1 (!%p1531_p2), %785  ;;  %v782_v6 = vpop.permute.xlu0 (!%p1531_p2), %781 }
 0x594   : > { %v776_v0 = vld [vmem:[#allocation3 + $0x20] sm:$0xff]  ;;  %v774_v2 = vld [vmem:[#allocation3 + $0x8] sm:$0xff] }
 0x595   : > { %799 = vst [vmem:[#allocation4 + $0x18] sm:$0xff] %v776_v0  ;;  %798 = vst [vmem:[#allocation4 + $0x10] sm:$0xff] %v774_v2  ;;  %787 = vrot.lane.b32.xlu1 %v776_v0, %s1997_s13  ;;  %783 = vrot.lane.b32.xlu0 %v774_v2, %s1997_s13 }
 0x599   : > { %810 = vrot.lane.b32.xlu1 %v801_v3, %s1998_s22  ;;  %808 = vrot.lane.b32.xlu0 %v774_v2, %s1998_s22 }
 0x59d   : > { %814 = vrot.lane.b32.xlu1 %v803_v4, %s1998_s22  ;;  %812 = vrot.lane.b32.xlu0 %v776_v0, %s1998_s22 }
 0x607   : > { %v788_v7 = vpop.permute.xlu1 %787  ;;  %v784_v8 = vpop.permute.xlu0 %783 }
 0x608   : > { %v791_v9 = vsel %vm789_vm4, %v786_v5, %v788_v7  ;;  %v790_v10 = vsel %vm789_vm4, %v782_v6, %v784_v8 }
 0x609   : > { %795 = vst [vmem:[#allocation4 + $0x8] sm:$0xff] %v791_v9  ;;  %794 = vst [vmem:[#allocation4] sm:$0xff] %v790_v10 }
 0x60b   : > { %v811_v11 = vpop.permute.xlu1 %810  ;;  %v809_v12 = vpop.permute.xlu0 %808 }
 0x60c   : > { %v817_v13 = vsel %vm816_vm5, %v809_v12, %v811_v11 }
 0x60d   : > { %821 = vst [vmem:[#allocation4 + $0x20] sm:$0xff] %v817_v13 }
 0x60f   : > { %v815_v14 = vpop.permute.xlu1 %814  ;;  %v813_v15 = vpop.permute.xlu0 %812 }
 0x610   : > { %v818_v16 = vsel %vm816_vm5, %v813_v15, %v815_v14 }
 0x611   : > { %822 = vst [vmem:[#allocation4 + $0x28] sm:$0xff] %v818_v16 }
 0x612 PF: > { %p1532_p3 = scmp.ne.s32.totalorder %s2371_s23, 1 }
 0x613   : > { %v829_v17 = vld [vmem:[#allocation3 + $0x18] sm:$0xff] (!%p1532_p3)  ;;  %v827_v18 = vld [vmem:[#allocation3] sm:$0xff] (!%p1532_p3)  ;;  %s1999_s19 = smov (!%p1532_p3), 2   ;;  %v855_v21 = vld [vmem:[#allocation3 + $0x10] sm:$0xff] (!%p1532_p3)  ;;  %s2000_s10 = smov (!%p1532_p3), 126   ;;  %vm843_vm6 = vcmask (!%p1532_p3), 15360  }
 0x614   : > { %826 = sbr.rel (%p1532_p3) target bundleno = 1686 (0x696), region = 76  ;;  %839 = vrot.lane.b32.xlu1 (!%p1532_p3), %v829_v17, %s1999_s19  ;;  %835 = vrot.lane.b32.xlu0 (!%p1532_p3), %v827_v18, %s1999_s19  ;;  %v857_v22 = vld [vmem:[#allocation3 + $0x28] sm:$0xff] (!%p1532_p3)  ;;  %vm870_vm7 = vcmask (!%p1532_p3), 1031168  }
 0x618   : > { %v830_v19 = vld [vmem:[#allocation3 + $0x20] sm:$0xff] (!%p1532_p3)  ;;  %v828_v20 = vld [vmem:[#allocation3 + $0x8] sm:$0xff] (!%p1532_p3) }
 0x619   : > { %853 = vst [vmem:[#allocation4 + $0x18] sm:$0xff] (!%p1532_p3), %v830_v19  ;;  %852 = vst [vmem:[#allocation4 + $0x10] sm:$0xff] (!%p1532_p3), %v828_v20  ;;  %841 = vrot.lane.b32.xlu1 (!%p1532_p3), %v830_v19, %s1999_s19  ;;  %837 = vrot.lane.b32.xlu0 (!%p1532_p3), %v828_v20, %s1999_s19 }
 0x61d   : > { %864 = vrot.lane.b32.xlu1 %v855_v21, %s2000_s10  ;;  %862 = vrot.lane.b32.xlu0 %v828_v20, %s2000_s10 }
 0x621   : > { %868 = vrot.lane.b32.xlu1 %v857_v22, %s2000_s10  ;;  %866 = vrot.lane.b32.xlu0 %v830_v19, %s2000_s10 }
 0x686   : > { %v840_v23 = vpop.permute.xlu1 %839  ;;  %v836_v24 = vpop.permute.xlu0 %835 }
 0x68b   : > { %v842_v25 = vpop.permute.xlu1 %841  ;;  %v838_v26 = vpop.permute.xlu0 %837 }
 0x68c   : > { %v845_v27 = vsel %vm843_vm6, %v840_v23, %v842_v25  ;;  %v844_v28 = vsel %vm843_vm6, %v836_v24, %v838_v26 }
 0x68d   : > { %849 = vst [vmem:[#allocation4 + $0x8] sm:$0xff] %v845_v27  ;;  %848 = vst [vmem:[#allocation4] sm:$0xff] %v844_v28 }
 0x68f   : > { %v865_v29 = vpop.permute.xlu1 %864  ;;  %v863_v30 = vpop.permute.xlu0 %862 }
 0x690   : > { %v871_v32 = vsel %vm870_vm7, %v863_v30, %v865_v29 }
 0x691   : > { %875 = vst [vmem:[#allocation4 + $0x20] sm:$0xff] %v871_v32 }
 0x693   : > { %v869_v33 = vpop.permute.xlu1 %868  ;;  %v867_v34 = vpop.permute.xlu0 %866 }
 0x694   : > { %v872_v35 = vsel %vm870_vm7, %v867_v34, %v869_v33 }
 0x695   : > { %876 = vst [vmem:[#allocation4 + $0x28] sm:$0xff] %v872_v35 }
 0x696 PF: > { %v879_v36 = vld [vmem:[#allocation4] sm:$0xff]  ;;  %v880_v37 = vld [vmem:[#allocation4 + $0x8] sm:$0xff]  ;;  %vm895_vm8 = vcmask 392192   ;;  %1789 = vset.pattern.permute.xlu0 %v1991_v57  ;;  %v2001_v42 = vmov 3   ;;  %vm2427_vm11 = vmpackc.low %vm483_vm0, %vm483_vm0  ;;  %p1539_p7 = scmp.ne.s32.totalorder %s1963_s26, 3 }
 0x697   : > { %v1612_v39 = vpack.c.bf16 %v880_v37, %v879_v36  ;;  %887 = vperm.xlu0 %1789, %v2323_v53   ;;  %1790 = vset.pattern.permute.xlu1 %v2001_v42  ;;  %v877_v46 = vld [vmem:[%s2272_s11] sm:$0xff]  ;;  %v878_v47 = vld [vmem:[%s2272_s11 + $0x8] sm:$0xff]  ;;  %s2004_s10 = smov (!%p1539_p7), 0.0   ;;  %vm2008_vm14 = vmmov (!%p1539_p7), 0  }
 0x698   : > { %v883_v44 = vld [vmem:[#allocation4 + $0x20] sm:$0xff]  ;;  %980 = vperm.xlu1 %1790, %v2323_v53   ;;  %1591 = vmatprep.mubr.msk.f32.mxu1 %vm895_vm8, %v877_v46 }
 0x699   : > { %1613 = vmatprep.subr.bf16.mxu1 %v1612_v39  ;;  %v1066_v36 = vld [vmem:[%s2277_s12] sm:$0xff] }
 0x69a   : > { %1615 = vmatpush3.bf16.msra.mxu1 %v1612_v39  ;;  %1598 = vmatprep.mubr.msk.f32.mxu0 %vm593_vm1, %v1066_v36 }
 0x69b   : > { %v881_v38 = vld [vmem:[#allocation4 + $0x10] sm:$0xff]  ;;  %v882_v41 = vld [vmem:[#allocation4 + $0x18] sm:$0xff]  ;;  %892 = vperm.xlu0 %1789, %v2326_v54  }
 0x69c   : > { %v1616_v43 = vpack.c.bf16 %v882_v41, %v881_v38  ;;  %v884_v45 = vld [vmem:[#allocation4 + $0x28] sm:$0xff]  ;;  %984 = vperm.xlu1 %1790, %v2326_v54  }
 0x69d   : > { %v1620_v57 = vpack.c.bf16 %v884_v45, %v883_v44 }
 0x69e   : > { %1617 = vmatprep.subr.bf16.mxu1 %v1616_v43 }
 0x69f   : > { %1619 = vmatpush3.bf16.msra.mxu1 %v1616_v43  ;;  %1791 = vset.pattern.permute.xlu0 %v1993_v31 }
 0x6a0   : > { %1621 = vmatprep.subr.bf16.mxu1 %v1620_v57  ;;  %1792 = vset.pattern.permute.xlu1 %v1993_v31 }
 0x6a3   : > { %1623 = vmatpush3.bf16.msra.mxu1 %v1620_v57 }
 0x6a6   : > { %1592 = vmatmul.mubr.msk.f32.vlgmr.msra.gmra.mrb[0].mxu1 %vm895_vm8, %v878_v47 }
 0x716   : > { %v888_v48 = vpop.permute.xlu0 %887 }
 0x717   : > { %v981_v49 = vpop.permute.xlu1 %980 }
 0x71a   : > { %v893_v50 = vpop.permute.xlu0 %892 }
 0x71b   : > { %v985_v60 = vpop.permute.xlu1 %984 }
 0x779   : > { %v1593_v55 = vpop.f32.mrb[0].mxu1 }
 0x77a   : > { %v974_v56 = vadd.f32 %v1593_v55, %v893_v50  ;;  %v968_v58 = vpop.f32.mrb[1].mxu1 }
 0x77b   : > { %v969_v62 = vadd.f32 %v968_v58, %v888_v48  ;;  %v2447_v58 = vld [vmem:[%s2543_s7] sm:$0xff] (!%p1539_p7) }
 0x77c   : > { %vm978_vm9 = vcmp.ge.f32.partialorder %v974_v56, 0.0  ;;  %v988_v63 = vmul.f32 %v985_v60, %v974_v56  ;;  %v2002_v60 = vmov (!%p1539_p7), 4  }
 0x77d   : > { %vm977_vm10 = vcmp.ge.f32.partialorder %v969_v62, 0.0  ;;  %v987_v0 = vmul.f32 %v981_v49, %v969_v62 }
 0x77e   : > { %v990_v2 = vsel %vm978_vm9, %v974_v56, %v988_v63 }
 0x77f   : > { %v989_v3 = vsel %vm977_vm10, %v969_v62, %v987_v0  ;;  %v2395_v31 = vsel %vm483_vm0, %v990_v2, 0.0 }
 0x780   : > { %v2399_v4 = vsel %vm483_vm0, %v989_v3, 0.0  ;;  %v1005_v5 = vmul.f32 %v2395_v31, %v2395_v31 }
 0x781   : > { %v993_v6 = vadd.f32 %v2395_v31, %v2399_v4  ;;  %v1004_v7 = vmul.f32 %v2399_v4, %v2399_v4 }
 0x783   : > { %994 = vadd.xlane.f32.xlu0 %v993_v6  ;;  %v1006_v8 = vadd.f32 %v1005_v5, %v1004_v7 }
 0x785   : > { %1007 = vadd.xlane.f32.xlu1 %v1006_v8 }
 0x810   : > { %v995_v9 = vpop.xlane.xlu0 %994 }
 0x811   : > { %v996_v10 = vrot.slane %v995_v9, 4 }
 0x812   : > { %v1008_v11 = vpop.xlane.xlu1 %1007 }
 0x813   : > { %v997_v12 = vadd.f32 %v996_v10, %v995_v9  ;;  %v1009_v13 = vrot.slane %v1008_v11, 4 }
 0x815   : > { %v998_v14 = vrot.slane %v997_v12, 2  ;;  %v1010_v15 = vadd.f32 %v1009_v13, %v1008_v11 }
 0x817   : > { %v1011_v16 = vrot.slane %v1010_v15, 2  ;;  %v999_v17 = vadd.f32 %v998_v14, %v997_v12 }
 0x819   : > { %v1000_v18 = vrot.slane %v999_v17, 1  ;;  %v1012_v19 = vadd.f32 %v1011_v16, %v1010_v15 }
 0x81b   : > { %v1001_v20 = vadd.f32 %v1000_v18, %v999_v17  ;;  %v1013_v21 = vrot.slane %v1012_v19, 1 }
 0x81d   : > { %1646 = vpush %v1001_v20  ;;  %v1014_v22 = vadd.f32 %v1013_v21, %v1012_v19  ;;  %v2003_v21 = vmov (!%p1539_p7), 2  }
 0x81f   : > { %1648 = vpush %v1014_v22 }
 0x84e   : > { %s1647_s11 = spop %1646 }
 0x84f   : > { %s1003_s1 = smul.f32 0.0009765625, %s1647_s11 }
 0x850   : > { %s1649_s2 = spop %1648 }
 0x851   : > { %s1017_s3 = smul.f32 %s1003_s1, %s1003_s1  ;;  %v1027_v28 = vstv %s1003_s1 }
 0x852   : > { %s1016_s4 = smul.f32 0.0009765625, %s1649_s2 }
 0x854   : > { %s1018_s14 = ssub.f32 %s1016_s4, %s1017_s3  ;;  %s2006_s3 = smov (!%p1539_p7), 1  }
 0x856   : > { %s1019_s18 = smax.f32 %s1994_s28, %s1018_s14 }
 0x857   : > { %s1020_s15 = sadd.f32 1e-08, %s1019_s18 }
 0x859   : > { %v1021_v23 = vstv %s1020_s15 }
 0x85a   : > { %1797 = vrsqrt.f32 %v1021_v23 }
 0x864   : > { %v1798_v24 = vpop.eup %1797 }
 0x865   : > { %1650 = vpush %v1798_v24 }
 0x896   : > { %s1651_s0 = spop %1650 }
 0x897   : > { %v1024_v25 = vstv %s1651_s0 }
 0x898   : > { %v1025_v26 = vmul.f32 %v1024_v25, %v2323_v53  ;;  %v1026_v27 = vmul.f32 %v1024_v25, %v2326_v54  ;;  %v2005_v25 = vmov (!%p1539_p7), 3  }
 0x89a   : > { %v1029_v29 = vmul.f32 %v1027_v28, %v1026_v27  ;;  %v1028_v30 = vmul.f32 %v1027_v28, %v1025_v26 }
 0x89c   : > { %1034 = vrot.lane.b32.xlu1 %v1029_v29, %s1995_s21  ;;  %1032 = vrot.lane.b32.xlu0 %v1028_v30, %s1995_s21 }
 0x8a0   : > { %1047 = vperm.xlu1 %1792, %v1026_v27   ;;  %1042 = vperm.xlu0 %1791, %v1025_v26  }
 0x8a4   : > { %1793 = vset.pattern.permute.xlu1 %v1996_v40  ;;  %1794 = vset.pattern.permute.xlu0 %v1996_v40 }
 0x90e   : > { %v1035_v32 = vpop.permute.xlu1 %1034  ;;  %v1033_v33 = vpop.permute.xlu0 %1032 }
 0x90f   : > { %v1039_v34 = vsub.f32 %v2326_v54, %v1035_v32  ;;  %v1038_v35 = vsub.f32 %v2323_v53, %v1033_v33 }
 0x911   : > { %1059 = vperm.xlu0 %1794, %v1039_v34   ;;  %1054 = vperm.xlu1 %1793, %v1038_v35  }
 0x915   : > { %1795 = vset.pattern.permute.xlu1 %v2001_v42  ;;  %1796 = vset.pattern.permute.xlu0 %v2001_v42 }
 0x916   : > { %1069 = vperm.xlu1 %1795, %v2334_v59   ;;  %1799 = vset.pattern.permute.xlu0 (!%p1539_p7), %v2002_v60 }
 0x917   : > { %1173 = vperm.xlu0 (!%p1539_p7), %1799, %v2447_v58  }
 0x91a   : > { %1073 = vperm.xlu1 %1795, %v2340_v61   ;;  %v1067_v61 = vld [vmem:[%s2277_s12 + $0x8] sm:$0xff] }
 0x91e   : > { %1802 = vset.pattern.permute.xlu1 (!%p1539_p7), %v2005_v25 }
 0x91f   : > { %v1048_v40 = vpop.permute.xlu1 %1047  ;;  %v1043_v37 = vpop.permute.xlu0 %1042 }
 0x920   : > { %v1051_v54 = vmul.f32 %v1048_v40, %v2395_v31  ;;  %v1050_v53 = vmul.f32 %v1043_v37, %v2399_v4  ;;  %v2007_v40 = vmov (!%p1539_p7), 0.0|0.0   ;;  %v2009_v37 = vmov (!%p1539_p7), 0.0  }
 0x990   : > { %v1055_v38 = vpop.permute.xlu1 %1054  ;;  %v1060_v39 = vpop.permute.xlu0 %1059 }
 0x991   : > { %v1062_v41 = vadd.f32 %v1055_v38, %v1050_v53  ;;  %v1063_v43 = vadd.f32 %v1060_v39, %v1051_v54  ;;  %v1261_v54 = vld [vmem:[%s2545_s9] sm:$0xff] (!%p1539_p7)  ;;  %v2010_v53 = vmov (!%p1539_p7), 0  }
 0x993   : > { %v1624_v59 = vpack.c.bf16 %v1063_v43, %v1062_v41 }
 0x995   : > { %1626 = vmatprep.subr.msk.bf16.mxu0 %vm2427_vm11, %v1624_v59  ;;  %v1070_v44 = vpop.permute.xlu1 %1069 }
 0x996   : > { %1629 = vmatpush3.bf16.msk.msra.mxu0 %vm2427_vm11, %v1624_v59 }
 0x997   : > { %1630 = vmatprep.subr.bf16.mxu0 (!%p1539_p7), %v2007_v40 }
 0x999   : > { %1599 = vmatmul.mubr.msk.f32.vlgmr.msra.gmra.mrb[2].mxu0 %vm593_vm1, %v1067_v61  ;;  %v1074_v45 = vpop.permute.xlu1 %1073 }
 0x99a   : > { %1605 = vmatprep.mubr.msk.f32.mxu0 (!%p1539_p7), %vm2008_vm14, %v2009_v37 }
 0xa6c   : > { %v1600_v46 = vpop.f32.mrb[2].mxu0 }
 0xa6d   : > { %v1154_v57 = vadd.f32 %v1600_v46, %v1074_v45  ;;  %v1148_v47 = vpop.f32.mrb[3].mxu0  ;;  %1166 = sbr.rel (%p1539_p7) target bundleno = 3556 (0xde4), region = 80 }
 0xa6e   : > { %v1149_v48 = vadd.f32 %v1148_v47, %v1070_v44 }
 0xa6f   : > { %v1158_v49 = vsel %vm483_vm0, %v1154_v57, 0.0  ;;  %v1260_v57 = vld [vmem:[#allocation10] sm:$0xff] (!%p1539_p7) }
 0xa70   : > { %v1160_v50 = vadd.f32 %v1158_v49, %v2320_v52  ;;  %v1157_v55 = vsel %vm483_vm0, %v1149_v48, 0.0  ;;  %v2453_v52 = vld [vmem:[%s2543_s7 + $0x8] sm:$0xff] (!%p1539_p7) }
 0xa71   : > { %v1159_v56 = vadd.f32 %v1157_v55, %v2318_v51  ;;  %1178 = vperm.xlu0 (!%p1539_p7), %1799, %v2453_v52   ;;  %v1174_v51 = vpop.permute.xlu0 (!%p1539_p7), %1173 }
 0xa72   : > { %1162 = vst [vmem:[#allocation2 + $0x8] sm:$0xff] %v1160_v50  ;;  %vm1170_vm13 = vcmp.ge.f32.partialorder (!%p1539_p7), %v1160_v50, 0.0 }
 0xa73   : > { %1161 = vst [vmem:[#allocation2] sm:$0xff] %v1159_v56  ;;  %v1181_v62 = vmul.f32 (!%p1539_p7), %v1174_v51, %v1159_v56  ;;  %vm1169_vm12 = vcmp.ge.f32.partialorder (!%p1539_p7), %v1159_v56, 0.0 }
 0xa75   : > { %v1183_v2 = vsel %vm1169_vm12, %v1159_v56, %v1181_v62  ;;  %1800 = vset.pattern.permute.xlu0 %v2003_v21 }
 0xa76   : > { %v2458_v31 = vsel %vm483_vm0, %v1183_v2, 0.0 }
 0xa77   : > { %v1198_v7 = vmul.f32 %v2458_v31, %v2458_v31 }
 0xaf0   : > { %v1179_v63 = vpop.permute.xlu0 %1178 }
 0xaf1   : > { %v1182_v0 = vmul.f32 %v1179_v63, %v1160_v50 }
 0xaf3   : > { %v1184_v3 = vsel %vm1170_vm13, %v1160_v50, %v1182_v0 }
 0xaf4   : > { %v2462_v4 = vsel %vm483_vm0, %v1184_v3, 0.0 }
 0xaf5   : > { %v1187_v5 = vadd.f32 %v2462_v4, %v2458_v31  ;;  %v1199_v6 = vmul.f32 %v2462_v4, %v2462_v4 }
 0xaf7   : > { %1188 = vadd.xlane.f32.xlu1 %v1187_v5  ;;  %v1200_v8 = vadd.f32 %v1199_v6, %v1198_v7 }
 0xafb   : > { %1201 = vadd.xlane.f32.xlu1 %v1200_v8 }
 0xb84   : > { %v1189_v9 = vpop.xlane.xlu1 %1188 }
 0xb85   : > { %v1190_v10 = vrot.slane %v1189_v9, 4 }
 0xb87   : > { %v1191_v11 = vadd.f32 %v1190_v10, %v1189_v9 }
 0xb88   : > { %v1202_v12 = vpop.xlane.xlu1 %1201 }
 0xb89   : > { %v1192_v13 = vrot.slane %v1191_v11, 2  ;;  %v1203_v1 = vrot.slane %v1202_v12, 4 }
 0xb8b   : > { %v1204_v14 = vadd.f32 %v1203_v1, %v1202_v12  ;;  %v1193_v15 = vadd.f32 %v1192_v13, %v1191_v11 }
 0xb8d   : > { %v1205_v16 = vrot.slane %v1204_v14, 2  ;;  %v1194_v17 = vrot.slane %v1193_v15, 1 }
 0xb8f   : > { %v1195_v18 = vadd.f32 %v1194_v17, %v1193_v15  ;;  %v1206_v19 = vadd.f32 %v1205_v16, %v1204_v14 }
 0xb91   : > { %1652 = vpush %v1195_v18  ;;  %v1207_v20 = vrot.slane %v1206_v19, 1 }
 0xb93   : > { %v1208_v22 = vadd.f32 %v1207_v20, %v1206_v19 }
 0xb95   : > { %1654 = vpush %v1208_v22 }
 0xbc2   : > { %s1653_s26 = spop %1652 }
 0xbc3   : > { %s1197_s21 = smul.f32 0.0009765625, %s1653_s26 }
 0xbc5   : > { %s1211_s23 = smul.f32 %s1197_s21, %s1197_s21  ;;  %v1221_v29 = vstv %s1197_s21 }
 0xbc6   : > { %s1655_s13 = spop %1654 }
 0xbc7   : > { %s1210_s22 = smul.f32 0.0009765625, %s1655_s13 }
 0xbc9   : > { %s1212_s19 = ssub.f32 %s1210_s22, %s1211_s23 }
 0xbcb   : > { %s1213_s11 = smax.f32 %s2004_s10, %s1212_s19 }
 0xbcc   : > { %s1214_s1 = sadd.f32 1e-05, %s1213_s11 }
 0xbce   : > { %v1215_v23 = vstv %s1214_s1 }
 0xbcf   : > { %1805 = vrsqrt.f32 %v1215_v23 }
 0xbd9   : > { %v1806_v24 = vpop.eup %1805 }
 0xbda   : > { %1656 = vpush %v1806_v24 }
 0xc0b   : > { %s1657_s2 = spop %1656 }
 0xc0c   : > { %v1218_v26 = vstv %s1657_s2 }
 0xc0d   : > { %v1219_v27 = vmul.f32 %v1218_v26, %v2447_v58  ;;  %v1220_v28 = vmul.f32 %v1218_v26, %v2453_v52 }
 0xc0f   : > { %v1222_v30 = vmul.f32 %v1221_v29, %v1219_v27  ;;  %v1223_v32 = vmul.f32 %v1221_v29, %v1220_v28 }
 0xc11   : > { %1228 = vrot.lane.b32.xlu1 %v1223_v32, %s2006_s3  ;;  %1226 = vrot.lane.b32.xlu0 %v1222_v30, %s2006_s3 }
 0xc15   : > { %1236 = vperm.xlu0 %1800, %v1219_v27  }
 0xc19   : > { %1241 = vperm.xlu0 %1800, %v1220_v28  }
 0xc1d   : > { %1801 = vset.pattern.permute.xlu0 %v2005_v25 }
 0xc83   : > { %v1229_v33 = vpop.permute.xlu1 %1228  ;;  %v1227_v34 = vpop.permute.xlu0 %1226 }
 0xc84   : > { %v1233_v35 = vsub.f32 %v2453_v52, %v1229_v33  ;;  %v1232_v36 = vsub.f32 %v2447_v58, %v1227_v34 }
 0xc86   : > { %1253 = vperm.xlu1 %1802, %v1233_v35   ;;  %1248 = vperm.xlu0 %1801, %v1232_v36  }
 0xc8a   : > { %1803 = vset.pattern.permute.xlu1 %v2010_v53  ;;  %1804 = vset.pattern.permute.xlu0 %v2010_v53 }
 0xc8b   : > { %1264 = vperm.xlu1 %1803, %v1261_v54  }
 0xc94   : > { %v1237_v38 = vpop.permute.xlu0 %1236 }
 0xc95   : > { %v1244_v41 = vmul.f32 %v1237_v38, %v2458_v31 }
 0xc98   : > { %v1242_v39 = vpop.permute.xlu0 %1241 }
 0xc99   : > { %v1245_v43 = vmul.f32 %v1242_v39, %v2462_v4 }
 0xd05   : > { %v1254_v59 = vpop.permute.xlu1 %1253  ;;  %v1249_v61 = vpop.permute.xlu0 %1248 }
 0xd06   : > { %v1257_v44 = vadd.f32 %v1254_v59, %v1245_v43  ;;  %v1256_v45 = vadd.f32 %v1249_v61, %v1244_v41 }
 0xd08   : > { %v1631_v46 = vpack.c.bf16 %v1257_v44, %v1256_v45 }
 0xd0a   : > { %1633 = vmatpush3.bf16.msk.msra.mxu0 %vm2427_vm11, %v1631_v46  ;;  %v1265_v47 = vpop.permute.xlu1 %1264 }
 0xd0d   : > { %1606 = vmatmul.mubr.msk.f32.vlgmr.msra.gmra.mrb[0].mxu0 %vm593_vm1, %v1260_v57 }
 0xde0   : > { %v1336_v48 = vpop.f32.mrb[0].mxu0 }
 0xde1   : > { %v1337_v49 = vadd.f32 %v1336_v48, %v1265_v47  ;;  %v1607_v50 = vpop.f32.mrb[1].mxu0 }
 0xde3   : > { %1340 = vst [vmem:[%s2289_s30] sm:$0xff] %v1337_v49 }
 0xde4 PF: > { %s1544_s18 = sshll.u32 %s1967_s27, 7  ;;  %s2595_s12 = sld [smem:[#allocation29_spill]] }
 0xde5   : > { %s1355_s29 = sshll.u32 %s2289_s30, 4  ;;  %s1342_s8 = scalar_lea.sflag [#allocation9], %s2246_s17  ;;  %s1356_s29 = int_to_ptr.vmem [resolvable:$true] %s1355_s29 }
 0xde6   : > { %s1875_s26 = scalar_lea.vmem %s1356_s29, 128  ;;  %p2596_p11 = scmp.ne.s32.totalorder %s2574_s16, 0 }
 0xde7   : > { %p1876_p6 = scmp.ne.s32.totalorder %s1356_s29, %s1875_s26  ;;  %s2011_s21 = smov [#allocation12]  }
 0xde8   : > { %s1879_s23 = sshll.u32 %s2011_s21, 4  ;;  %s1880_s23 = int_to_ptr.vmem [resolvable:$false] %s1879_s23 }
 0xde9   : > { %p1877_p4 = pnand %p1876_p6, %p2596_p11  ;;  %s1881_s13 = scalar_lea.vmem %s1880_s23, 256 }
 0xdea   : > { %s2487_s28 = scalar_lea.hbm %s2595_s12, %s1544_s18  ;;  %p1882_p9 = scmp.lt.s32.totalorder %s1356_s29, %s1880_s23 }
 0xdeb   : > { %p1878_p8 = pneg %p1877_p4  ;;  %p1883_p13 = scmp.lt.s32.totalorder %s1881_s13, %s1875_s26 }
 0xded   : > { %p1884_p1 = por %p1883_p13, %p1882_p9 }
 0xdef   : > { %p1885_p5 = pnand %p1884_p1, %p1878_p8 }
 0xdf1   : > { %1888 = shalt.err (!%p1885_p5)
}
 0xdf2   : > { %s1889_s27 = scalar_lea.hbm %s2487_s28, 128  ;;  %s1893_s22 = scalar_lea.hbm %s2595_s12, 256 }
 0xdf3   : > { %p1890_p10 = scmp.ne.s32.totalorder %s2487_s28, %s1889_s27  ;;  %p1894_p2 = scmp.lt.u32.totalorder %s2487_s28, %s2595_s12 }
 0xdf4   : > { %p1895_p3 = scmp.lt.u32.totalorder %s1893_s22, %s1889_s27  ;;  %p1897_p6 = scmp.lt.u32.totalorder %s1889_s27, %s2487_s28 }
 0xdf5   : > { %p1891_p12 = pnand %p1890_p10, %p2596_p11 }
 0xdf6   : > { %p1896_p7 = por %p1895_p3, %p1894_p2 }
 0xdf7   : > { %p1892_p0 = pneg %p1891_p12 }
 0xdf8   : > { %p1898_p4 = por %p1897_p6, %p1896_p7 }
 0xdfa   : > { %p1899_p8 = pnand %p1898_p4, %p1892_p0 }
 0xdfc   : > { %1902 = shalt.err (!%p1899_p8)
}
 0xdfd   : > { %1664 = dma.vmem_to_hbm [thread:$0]  (%p2596_p11), %s1356_s29, 128, %s2487_s28, %s1342_s8  }
 0xdfe PF: > { %s2597_s11 = sld [smem:[#allocation20_spill]]  ;;  %s2598_s1 = sld [smem:[#allocation17_spill]] }
 0xdff   : > { %s2599_s2 = sld [smem:[#allocation21_spill]] }
 0xe04   : > { %p1681_p9 = scmp.ge.s32.totalorder %s2597_s11, 2  ;;  %s1367_s3 = sand.u32 1, %s2598_s1  }
 0xe05   : > { %p2600_p13 = scmp.ne.s32.totalorder %s2599_s2, 0  ;;  %s1368_s4 = scalar_lea.sflag [#allocation9], %s1367_s3 }
 0xe07   : > { %p1675_p1 = pnand %p1681_p9, %p2600_p13 }
 0xe09   : > { %1946 = dma.done.wait (!%p1675_p1), %s1368_s4, 128  }
 0xe0a   : > { %1948 = vsyncadd (!%p1675_p1), %s1368_s4, 4294967168  ;;  %s31_s29 = sadd.s32 1, %s2597_s11   ;;  %s2601_s26 = sld [smem:[#allocation18_spill]] }
 0xe0b   : > { %p28_p5 = scmp.ge.s32.totalorder %s31_s29, 10   ;;  %s2602_s27 = sld [smem:[#allocation19_spill]] }
 0xe0c   : > { %s2603_s28 = sld [smem:[#allocation22_spill]]  ;;  %s2604_s0 = sld [smem:[#allocation23_spill]] }
 0xe0d   : > { %s2605_s23 = smov %s1955_s24  ;;  %s2606_s24 = smov %s1959_s25 }
 0xe0e   : > { %s2607_s25 = smov %s2241_s20  ;;  %30 = sbr.rel (!%p28_p5) target bundleno = 21 (0x15), region = 136 }
 0xe15   :  { %1373 = vsyncpa [#allocation8], 1 }
 0xe16   :  { %1375 = vsyncpa [#allocation8 + $0x1], 1 }
 0xe17   :  { %1376 = vsyncpa [#allocation11], 1 }
 0xe18   :  { %1377 = vsyncpa [#allocation9], 1 }
 0xe19   :  { %1379 = vsyncpa [#allocation9 + $0x1], 1 }

</bundles_post_ra>
